<compile_context>
chip_gen: v7x
topology: tpu7x:2x2x1
jax: 0.10.0
libtpu: 0.0.40
codegen_flags: <defaults>
</compile_context>

<pallas_src>
import functools

import jax
import jax.numpy as jnp
from jax import lax
from jax.experimental import pallas as pl
from jax.experimental.pallas import tpu as pltpu

NEG_SLOPE = 0.01      # F.leaky_relu default negative_slope
NEG_BIG = -1e30       # finite "-inf" (avoids 0 * inf = NaN)


def _leaky_relu(v):
    return jnp.where(v >= 0, v, NEG_SLOPE * v)


def _vmem_limit_bytes():
    """Per-generation VMEM limit (v7x has 64 MiB physical, v5e/v6e 128 MiB)."""
    cap = 0
    try:
        cap = int(getattr(pltpu.get_tpu_info(), "vmem_capacity_bytes", 0) or 0)
    except Exception:
        cap = 0
    if cap <= 0:
        cap = 128 * 1024 * 1024
    return int(min(cap * 3 // 4, 96 * 1024 * 1024))


def gat_kernel(idx_ref, x_ref, rel_ref, wc_ref, out_ref,
               f_scr, g_col, m_col, l_col, acc):
    f32 = jnp.float32
    t = pl.program_id(0)
    nt = pl.num_programs(0)

    TE = idx_ref.shape[1]
    N, EH = x_ref.shape
    R, RH = rel_ref.shape
    NPR = N + R
    W = RH + EH
    neg = jnp.float32(NEG_BIG)

    # ---- one-time init (grid step 0): combined feature table + state.
    @pl.when(t == 0)
    def _init():
        ef = _leaky_relu(x_ref[...])                                    # [N, EH]
        rf = _leaky_relu(rel_ref[...])                                  # [R, RH]
        top = jnp.concatenate([jnp.zeros((N, RH), f32), ef], axis=1)    # node rows
        bot = jnp.concatenate([rf, jnp.zeros((R, EH), f32)], axis=1)    # rel rows
        fmat = jnp.concatenate([top, bot], axis=0)                      # [NPR, W]
        f_scr[...] = fmat
        # g[k] = wt . lrelu(x)[k]          for node rows (tail projection)
        #      = wr . lrelu(rel)[k-N]      for rel rows   -- lane reduction, no MXU
        g_col[...] = jnp.sum(fmat * wc_ref[...], axis=1, keepdims=True)  # [NPR, 1]
        m_col[...] = jnp.full_like(m_col, neg)
        l_col[...] = jnp.zeros_like(l_col)
        acc[...] = jnp.zeros_like(acc)

    # ---- per-edge-tile work (single pass, online softmax).
    # Padded edges carry out-of-range ids -> all-false one-hot columns -> inert.
    idx = idx_ref[...]                                     # [3, TE] int32
    idx_i = idx[0:1, :]                                    # [1, TE] destination
    idx_j = idx[1:2, :]                                    # [1, TE] source
    idx_r = idx[2:3, :]                                    # [1, TE] relation

    iota_n = lax.broadcasted_iota(jnp.int32, (N, TE), 0)
    iota_p = lax.broadcasted_iota(jnp.int32, (NPR, TE), 0)
    mask_i = iota_n == idx_i                               # [N, TE]  destination one-hot
    hit_jr = (iota_p == idx_j) | (iota_p == (idx_r + N))   # [NPR,TE] src-row + rel-row hits

    # Attention logits a_t[src] + a_r[rel]; the a_h[dst] term is constant per softmax
    # group and cancels, so it is dropped.  Gathered via XLU sublane reductions.
    att = jnp.sum(jnp.where(hit_jr, g_col[...], 0.0), axis=0, keepdims=True)   # [1, TE]

    # Online-softmax running max per destination (rescale broadcast is lane-wise, free).
    scores = jnp.where(mask_i, att, neg)                   # [N, TE]
    tile_max = jnp.max(scores, axis=1, keepdims=True)      # [N, 1]
    m_old = m_col[...]
    m_new = jnp.maximum(m_old, tile_max)
    alpha = jnp.exp(m_old - m_new)                         # [N, 1]
    m_col[...] = m_new

    # Per-edge exp weights (max gathered back per edge, clamp keeps padded rows finite).
    m_e = jnp.max(jnp.where(mask_i, m_new, neg), axis=0, keepdims=True)        # [1, TE]
    w_e = jnp.exp(jnp.minimum(att - m_e, 0.0))                                  # [1, TE]
    we = jnp.where(mask_i, w_e, 0.0)                       # [N, TE] weighted dst one-hot

    # Fused gather (rel+tail features in one matmul) and fused scatter (one wide matmul).
    oh_jr = hit_jr.astype(f32)                                                  # [NPR, TE]
    rhs = lax.dot_general(oh_jr, f_scr[...], (((0,), (0,)), ((), ())),
                          preferred_element_type=f32)      # [TE, W] = [e_rel | e_tail]
    acc[...] = alpha * acc[...] + jnp.dot(we, rhs, preferred_element_type=f32)  # [N, W]
    l_col[...] = alpha * l_col[...] + jnp.sum(we, axis=1, keepdims=True)        # [N, 1]

    # ---- finalize at the last tile: exact normalization, one lane-dense write.
    @pl.when(t == nt - 1)
    def _finalize():
        l = l_col[...]
        inv_l = 1.0 / (l + 1e-16)                          # exact (correctness fix)
        frac = l * inv_l                                   # ~1 if node has edges, else 0
        out_h = _leaky_relu(x_ref[...]) * frac             # softmax weights sum to 1
        out_rt = acc[...] * inv_l                          # [N, W] = [rel | tail] halves
        pieces = [out_h, out_rt]
        pad_w = out_ref.shape[1] - (EH + W)
        if pad_w > 0:
            pieces.append(jnp.zeros((N, pad_w), f32))
        out_ref[...] = jnp.concatenate(pieces, axis=1)


@functools.partial(jax.jit, static_argnums=(5, 6, 7))
def gat_forward(x, edge_index_all, rel_all, rel_emb, w, e_hidden, r_hidden,
                edge_tile):
    N = x.shape[0]
    R = rel_emb.shape[0]
    E = edge_index_all.shape[1]
    NPR = N + R

    # lane-aligned edge tile (BlockSpec last dim must be a multiple of 128)
    TE = max(128, (int(edge_tile) // 128) * 128)
    E_pad = ((E + TE - 1) // TE) * TE
    nt = E_pad // TE

    # Packed indices: one (3, E_pad) int32 input -> one DMA descriptor per tile.
    # Padded (dummy) edges use out-of-range ids so every one-hot column is all-false.
    idx = jnp.stack([edge_index_all[0].astype(jnp.int32),
                     edge_index_all[1].astype(jnp.int32),
                     rel_all.astype(jnp.int32)], axis=0)          # [3, E]
    if E_pad > E:
        fill = jnp.array([[N], [NPR], [R]], jnp.int32)            # dst / src / rel fills
        idx = jnp.concatenate(
            [idx, jnp.broadcast_to(fill, (3, E_pad - E))], axis=1)

    # ww1 columns: [head (eh) | rel (rh) | tail (eh)].  The head part only shifts each
    # destination's logits by a constant (softmax-invariant) -> only rel+tail are needed,
    # laid out to match the combined feature table columns [rel | tail].
    w = w.astype(jnp.float32)
    wc = jnp.concatenate([w[:, e_hidden:e_hidden + r_hidden],
                          w[:, e_hidden + r_hidden:]], axis=1)    # [1, rh + eh]

    out_w = 2 * e_hidden + r_hidden
    out_pad = ((out_w + 127) // 128) * 128                        # lane-dense output width
    W = e_hidden + r_hidden

    resident = lambda shape: pl.BlockSpec(shape, lambda t: tuple(0 for _ in shape))

    out = pl.pallas_call(
        gat_kernel,
        out_shape=jax.ShapeDtypeStruct((N, out_pad), jnp.float32),
        grid=(nt,),                                               # single edge-tile pass
        in_specs=[
            pl.BlockSpec((3, TE), lambda t: (0, t)),              # packed edge indices
            resident((N, e_hidden)),                              # x
            resident((R, r_hidden)),                              # rel_emb
            resident((1, W)),                                     # [wr | wt] row
        ],
        out_specs=pl.BlockSpec((N, out_pad), lambda t: (0, 0)),
        scratch_shapes=[
            pltpu.VMEM((NPR, W), jnp.float32),   # F: [rel | tail] feature table (lrelu'd)
            pltpu.VMEM((NPR, 1), jnp.float32),   # g: a_t (node rows) / a_r (rel rows)
            pltpu.VMEM((N, 1), jnp.float32),     # running per-destination max
            pltpu.VMEM((N, 1), jnp.float32),     # segment sum of exp
            pltpu.VMEM((N, W), jnp.float32),     # fused scatter accumulator [rel | tail]
        ],
        compiler_params=pltpu.CompilerParams(
            dimension_semantics=("arbitrary",),
            vmem_limit_bytes=_vmem_limit_bytes(),
        ),
    )(idx, x.astype(jnp.float32), rel_emb.astype(jnp.float32), wc)

    return out[:, :out_w]


class GraphAttentionWjq:
    """JAX/Pallas port of GraphAttention_wjq (ww1 = Linear(700, 1, bias=False))."""

    def __init__(self, e_hidden, r_hidden, key, edge_tile=512):
        assert 2 * e_hidden + r_hidden == 700, "ww1 expects 700 input features"
        self.e_hidden = e_hidden
        self.r_hidden = r_hidden
        self.edge_tile = edge_tile
        bound = 1.0 / (700 ** 0.5)   # PyTorch default Linear init range
        self.w = jax.random.uniform(key, (1, 700), jnp.float32, -bound, bound)

    def __call__(self, x, edge_index_all, rel_all, rel_emb):
        return gat_forward(x, edge_index_all, rel_all, rel_emb, self.w,
                           self.e_hidden, self.r_hidden, self.edge_tile)


def gat_reference(x, edge_index_all, rel_all, rel_emb, w):
    """Pure-JAX reference mirroring the PyTorch forward semantics."""
    ef = _leaky_relu(x)
    rf = _leaky_relu(rel_emb)
    i = edge_index_all[0]
    j = edge_index_all[1]
    e_head = ef[i]
    e_tail = ef[j]
    e_rel = rf[rel_all]
    cat = jnp.concatenate([e_head, e_rel, e_tail], axis=1)
    att = (cat @ w.T)[:, 0]
    N = x.shape[0]
    seg_max = jax.ops.segment_max(att, i, num_segments=N)
    exp_att = jnp.exp(att - seg_max[i])
    seg_sum = jax.ops.segment_sum(exp_att, i, num_segments=N)
    att_n = exp_att / (seg_sum[i] + 1e-16)
    return jax.ops.segment_sum(cat * att_n[:, None], i, num_segments=N)


if __name__ == "__main__":
    key = jax.random.PRNGKey(0)
    k_x, k_rel, k_i, k_j, k_r, k_w = jax.random.split(key, 6)

    e_hidden, r_hidden = 300, 100    # 2*e_hidden + r_hidden = 700 (fixed by ww1)
    N, R, E = 16, 8, 300             # nodes, relations, edges (small test sizes)

    x = jax.random.normal(k_x, (N, e_hidden), jnp.float32)
    rel_emb = jax.random.normal(k_rel, (R, r_hidden), jnp.float32)
    edge_index_all = jnp.stack([
        jax.random.randint(k_i, (E,), 0, N, jnp.int32),
        jax.random.randint(k_j, (E,), 0, N, jnp.int32)], axis=0)
    rel_all = jax.random.randint(k_r, (E,), 0, R, jnp.int32)

    # edge_tile=128 -> 3 edge tiles, exercising the online-softmax rescale + padding path
    module = GraphAttentionWjq(e_hidden, r_hidden, k_w, edge_tile=128)
    out = module(x, edge_index_all, rel_all, rel_emb)
    out = jax.block_until_ready(out)

    ref = gat_reference(x, edge_index_all, rel_all, rel_emb, module.w)
    assert out.shape == (N, 2 * e_hidden + r_hidden), out.shape
    assert jnp.allclose(out, ref, rtol=1e-3, atol=1e-3), \
        float(jnp.max(jnp.abs(out - ref)))

    print("KERNEL_OK")
</pallas_src>

<mosaic_0001>
module attributes {stable_mosaic.version = 11 : i64} {
  func.func @gat_kernel(%arg0: i32, %arg1: memref<3x128xi32, #tpu.memory_space<vmem>>, %arg2: memref<16x300xf32, #tpu.memory_space<vmem>>, %arg3: memref<8x100xf32, #tpu.memory_space<vmem>>, %arg4: memref<1x400xf32, #tpu.memory_space<vmem>>, %arg5: memref<16x768xf32, #tpu.memory_space<vmem>>, %arg6: memref<24x400xf32, #tpu.memory_space<vmem>>, %arg7: memref<24x1xf32, #tpu.memory_space<vmem>>, %arg8: memref<16x1xf32, #tpu.memory_space<vmem>>, %arg9: memref<16x1xf32, #tpu.memory_space<vmem>>, %arg10: memref<16x400xf32, #tpu.memory_space<vmem>>) attributes {dimension_semantics = [#tpu.dimension_semantics<arbitrary>], iteration_bounds = array<i64: 3>, scalar_prefetch = 0 : i64, scratch_operands = 5 : i64, tpu.core_type = #tpu.core_type<tc>, window_params = [{transform_indices = @transform_0, window_bounds = array<i64: 3, 128>}, {pipeline_mode = #tpu.pipeline_mode<synchronous>, transform_indices = @transform_1, window_bounds = array<i64: 16, 300>}, {pipeline_mode = #tpu.pipeline_mode<synchronous>, transform_indices = @transform_2, window_bounds = array<i64: 8, 100>}, {pipeline_mode = #tpu.pipeline_mode<synchronous>, transform_indices = @transform_3, window_bounds = array<i64: 1, 400>}, {pipeline_mode = #tpu.pipeline_mode<synchronous>, transform_indices = @transform_4, window_bounds = array<i64: 16, 768>}]} {
    %c0_i32 = arith.constant 0 : i32
    %0 = arith.cmpi eq, %arg0, %c0_i32 : i32
    %1 = arith.extui %0 : i1 to i32
    %cst = arith.constant -1.000000e+30 : f32
    %c0_i32_0 = arith.constant 0 : i32
    %2 = arith.cmpi ne, %1, %c0_i32_0 : i32
    scf.if %2 {
      %c0_30 = arith.constant 0 : index
      %c0_31 = arith.constant 0 : index
      %69 = vector.load %arg2[%c0_30, %c0_31] : memref<16x300xf32, #tpu.memory_space<vmem>>, vector<16x300xf32>
      %cst_32 = arith.constant 0.000000e+00 : f32
      %70 = vector.broadcast %cst_32 : f32 to vector<16x300xf32>
      %71 = arith.cmpf oge, %69, %70 : vector<16x300xf32>
      %cst_33 = arith.constant 0.00999999977 : f32
      %72 = vector.broadcast %cst_33 : f32 to vector<16x300xf32>
      %73 = arith.mulf %72, %69 : vector<16x300xf32>
      %74 = arith.select %71, %69, %73 : vector<16x300xi1>, vector<16x300xf32>
      %c0_34 = arith.constant 0 : index
      %c0_35 = arith.constant 0 : index
      %75 = vector.load %arg3[%c0_34, %c0_35] : memref<8x100xf32, #tpu.memory_space<vmem>>, vector<8x100xf32>
      %cst_36 = arith.constant 0.000000e+00 : f32
      %76 = vector.broadcast %cst_36 : f32 to vector<8x100xf32>
      %77 = arith.cmpf oge, %75, %76 : vector<8x100xf32>
      %cst_37 = arith.constant 0.00999999977 : f32
      %78 = vector.broadcast %cst_37 : f32 to vector<8x100xf32>
      %79 = arith.mulf %78, %75 : vector<8x100xf32>
      %80 = arith.select %77, %75, %79 : vector<8x100xi1>, vector<8x100xf32>
      %cst_38 = arith.constant 0.000000e+00 : f32
      %81 = vector.broadcast %cst_38 : f32 to vector<16x100xf32>
      %82 = tpu.concatenate %81, %74 in 1 : vector<16x100xf32>, vector<16x300xf32> -> vector<16x400xf32>
      %cst_39 = arith.constant 0.000000e+00 : f32
      %83 = vector.broadcast %cst_39 : f32 to vector<8x300xf32>
      %84 = tpu.concatenate %80, %83 in 1 : vector<8x100xf32>, vector<8x300xf32> -> vector<8x400xf32>
      %85 = tpu.concatenate %82, %84 in 0 : vector<16x400xf32>, vector<8x400xf32> -> vector<24x400xf32>
      %c0_40 = arith.constant 0 : index
      %c0_41 = arith.constant 0 : index
      %86 = vector.load %arg6[%c0_40, %c0_41] : memref<24x400xf32, #tpu.memory_space<vmem>>, vector<24x400xf32>
      tpu.vector_store %arg6[%c0_40, %c0_41], %85 {strides = array<i32>} : memref<24x400xf32, #tpu.memory_space<vmem>>, vector<24x400xf32>,
      %c0_42 = arith.constant 0 : index
      %c0_43 = arith.constant 0 : index
      %87 = vector.load %arg4[%c0_42, %c0_43] : memref<1x400xf32, #tpu.memory_space<vmem>>, vector<1x400xf32>
      %88 = vector.broadcast %87 : vector<1x400xf32> to vector<24x400xf32>
      %89 = arith.mulf %85, %88 : vector<24x400xf32>
      %cst_44 = arith.constant dense<0.000000e+00> : vector<24xf32>
      %90 = vector.multi_reduction <add>, %89, %cst_44 [1] : vector<24x400xf32> to vector<24xf32>
      %91 = vector.shape_cast %90 : vector<24xf32> to vector<24x1xf32>
      %c0_45 = arith.constant 0 : index
      %c0_46 = arith.constant 0 : index
      %92 = vector.load %arg7[%c0_45, %c0_46] : memref<24x1xf32, #tpu.memory_space<vmem>>, vector<24x1xf32>
      tpu.vector_store %arg7[%c0_45, %c0_46], %91 {strides = array<i32>} : memref<24x1xf32, #tpu.memory_space<vmem>>, vector<24x1xf32>,
      %93 = vector.broadcast %cst : f32 to vector<16x1xf32>
      %c0_47 = arith.constant 0 : index
      %c0_48 = arith.constant 0 : index
      %94 = vector.load %arg8[%c0_47, %c0_48] : memref<16x1xf32, #tpu.memory_space<vmem>>, vector<16x1xf32>
      tpu.vector_store %arg8[%c0_47, %c0_48], %93 {strides = array<i32>} : memref<16x1xf32, #tpu.memory_space<vmem>>, vector<16x1xf32>,
      %cst_49 = arith.constant 0.000000e+00 : f32
      %95 = vector.broadcast %cst_49 : f32 to vector<16x1xf32>
      %c0_50 = arith.constant 0 : index
      %c0_51 = arith.constant 0 : index
      %96 = vector.load %arg9[%c0_50, %c0_51] : memref<16x1xf32, #tpu.memory_space<vmem>>, vector<16x1xf32>
      tpu.vector_store %arg9[%c0_50, %c0_51], %95 {strides = array<i32>} : memref<16x1xf32, #tpu.memory_space<vmem>>, vector<16x1xf32>,
      %cst_52 = arith.constant 0.000000e+00 : f32
      %97 = vector.broadcast %cst_52 : f32 to vector<16x400xf32>
      %c0_53 = arith.constant 0 : index
      %c0_54 = arith.constant 0 : index
      %98 = vector.load %arg10[%c0_53, %c0_54] : memref<16x400xf32, #tpu.memory_space<vmem>>, vector<16x400xf32>
      tpu.vector_store %arg10[%c0_53, %c0_54], %97 {strides = array<i32>} : memref<16x400xf32, #tpu.memory_space<vmem>>, vector<16x400xf32>,
    } else {
    }
    %c0 = arith.constant 0 : index
    %c0_1 = arith.constant 0 : index
    %3 = vector.load %arg1[%c0, %c0_1] : memref<3x128xi32, #tpu.memory_space<vmem>>, vector<3x128xi32>
    %4 = vector.extract_strided_slice %3 {offsets = [0, 0], sizes = [1, 128], strides = [1, 1]} : vector<3x128xi32> to vector<1x128xi32>
    %5 = vector.extract_strided_slice %3 {offsets = [1, 0], sizes = [1, 128], strides = [1, 1]} : vector<3x128xi32> to vector<1x128xi32>
    %6 = vector.extract_strided_slice %3 {offsets = [2, 0], sizes = [1, 128], strides = [1, 1]} : vector<3x128xi32> to vector<1x128xi32>
    %7 = tpu.iota {dimensions = array<i32: 0>} : vector<16x128xi32>
    %8 = tpu.iota {dimensions = array<i32: 0>} : vector<24x128xi32>
    %9 = vector.broadcast %4 : vector<1x128xi32> to vector<16x128xi32>
    %10 = arith.cmpi eq, %7, %9 : vector<16x128xi32>
    %11 = vector.broadcast %5 : vector<1x128xi32> to vector<24x128xi32>
    %12 = arith.cmpi eq, %8, %11 : vector<24x128xi32>
    %c16_i32 = arith.constant 16 : i32
    %13 = vector.broadcast %c16_i32 : i32 to vector<1x128xi32>
    %14 = arith.addi %6, %13 : vector<1x128xi32>
    %15 = vector.broadcast %14 : vector<1x128xi32> to vector<24x128xi32>
    %16 = arith.cmpi eq, %8, %15 : vector<24x128xi32>
    %17 = arith.ori %12, %16 : vector<24x128xi1>
    %c0_2 = arith.constant 0 : index
    %c0_3 = arith.constant 0 : index
    %18 = vector.load %arg7[%c0_2, %c0_3] : memref<24x1xf32, #tpu.memory_space<vmem>>, vector<24x1xf32>
    %cst_4 = arith.constant 0.000000e+00 : f32
    %19 = vector.shape_cast %18 : vector<24x1xf32> to vector<24x1xf32>
    %20 = vector.broadcast %19 : vector<24x1xf32> to vector<24x128xf32>
    %21 = vector.broadcast %cst_4 : f32 to vector<24x128xf32>
    %22 = arith.select %17, %20, %21 : vector<24x128xi1>, vector<24x128xf32>
    %cst_5 = arith.constant dense<0.000000e+00> : vector<128xf32>
    %23 = vector.multi_reduction <add>, %22, %cst_5 [0] : vector<24x128xf32> to vector<128xf32>
    %24 = vector.shape_cast %23 : vector<128xf32> to vector<1x128xf32>
    %cst_6 = arith.constant -1.000000e+30 : f32
    %25 = vector.shape_cast %24 : vector<1x128xf32> to vector<1x128xf32>
    %26 = vector.broadcast %25 : vector<1x128xf32> to vector<16x128xf32>
    %27 = vector.broadcast %cst_6 : f32 to vector<16x128xf32>
    %28 = arith.select %10, %26, %27 : vector<16x128xi1>, vector<16x128xf32>
    %cst_7 = arith.constant dense<0xFF800000> : vector<16xf32>
    %29 = vector.multi_reduction <maximumf>, %28, %cst_7 [1] : vector<16x128xf32> to vector<16xf32>
    %30 = vector.shape_cast %29 : vector<16xf32> to vector<16x1xf32>
    %c0_8 = arith.constant 0 : index
    %c0_9 = arith.constant 0 : index
    %31 = vector.load %arg8[%c0_8, %c0_9] : memref<16x1xf32, #tpu.memory_space<vmem>>, vector<16x1xf32>
    %32 = arith.maximumf %31, %30 : vector<16x1xf32>
    %33 = arith.subf %31, %32 : vector<16x1xf32>
    %34 = math.exp %33 : vector<16x1xf32>
    %c0_10 = arith.constant 0 : index
    %c0_11 = arith.constant 0 : index
    %35 = vector.load %arg8[%c0_10, %c0_11] : memref<16x1xf32, #tpu.memory_space<vmem>>, vector<16x1xf32>
    tpu.vector_store %arg8[%c0_10, %c0_11], %32 {strides = array<i32>} : memref<16x1xf32, #tpu.memory_space<vmem>>, vector<16x1xf32>,
    %cst_12 = arith.constant -1.000000e+30 : f32
    %36 = vector.shape_cast %32 : vector<16x1xf32> to vector<16x1xf32>
    %37 = vector.broadcast %36 : vector<16x1xf32> to vector<16x128xf32>
    %38 = vector.broadcast %cst_12 : f32 to vector<16x128xf32>
    %39 = arith.select %10, %37, %38 : vector<16x128xi1>, vector<16x128xf32>
    %cst_13 = arith.constant dense<0xFF800000> : vector<128xf32>
    %40 = vector.multi_reduction <maximumf>, %39, %cst_13 [0] : vector<16x128xf32> to vector<128xf32>
    %41 = vector.shape_cast %40 : vector<128xf32> to vector<1x128xf32>
    %42 = arith.subf %24, %41 : vector<1x128xf32>
    %cst_14 = arith.constant 0.000000e+00 : f32
    %43 = vector.broadcast %cst_14 : f32 to vector<1x128xf32>
    %44 = arith.minimumf %42, %43 : vector<1x128xf32>
    %45 = math.exp %44 : vector<1x128xf32>
    %cst_15 = arith.constant 0.000000e+00 : f32
    %46 = vector.shape_cast %45 : vector<1x128xf32> to vector<1x128xf32>
    %47 = vector.broadcast %46 : vector<1x128xf32> to vector<16x128xf32>
    %48 = vector.broadcast %cst_15 : f32 to vector<16x128xf32>
    %49 = arith.select %10, %47, %48 : vector<16x128xi1>, vector<16x128xf32>
    %50 = arith.extui %17 : vector<24x128xi1> to vector<24x128xi32>
    %51 = arith.sitofp %50 : vector<24x128xi32> to vector<24x128xf32>
    %c0_16 = arith.constant 0 : index
    %c0_17 = arith.constant 0 : index
    %52 = vector.load %arg6[%c0_16, %c0_17] : memref<24x400xf32, #tpu.memory_space<vmem>>, vector<24x400xf32>
    %cst_18 = arith.constant dense<0.000000e+00> : vector<128x400xf32>
    %53 = tpu.matmul %51, %52, %cst_18 {dimension_numbers = #tpu.dot_dimension_numbers<[0], [0], [1], [1], [0, 1, 1, 1], [], []>} : vector<24x128xf32>, vector<24x400xf32>, vector<128x400xf32> -> vector<128x400xf32>
    %c0_19 = arith.constant 0 : index
    %c0_20 = arith.constant 0 : index
    %54 = vector.load %arg10[%c0_19, %c0_20] : memref<16x400xf32, #tpu.memory_space<vmem>>, vector<16x400xf32>
    %55 = vector.broadcast %34 : vector<16x1xf32> to vector<16x400xf32>
    %56 = arith.mulf %55, %54 : vector<16x400xf32>
    %cst_21 = arith.constant dense<0.000000e+00> : vector<16x400xf32>
    %57 = tpu.matmul %49, %53, %cst_21 {dimension_numbers = #tpu.dot_dimension_numbers<[1], [0], [0], [1], [0, 0, 1, 1], [], []>} : vector<16x128xf32>, vector<128x400xf32>, vector<16x400xf32> -> vector<16x400xf32>
    %58 = arith.addf %56, %57 : vector<16x400xf32>
    %c0_22 = arith.constant 0 : index
    %c0_23 = arith.constant 0 : index
    %59 = vector.load %arg10[%c0_22, %c0_23] : memref<16x400xf32, #tpu.memory_space<vmem>>, vector<16x400xf32>
    tpu.vector_store %arg10[%c0_22, %c0_23], %58 {strides = array<i32>} : memref<16x400xf32, #tpu.memory_space<vmem>>, vector<16x400xf32>,
    %c0_24 = arith.constant 0 : index
    %c0_25 = arith.constant 0 : index
    %60 = vector.load %arg9[%c0_24, %c0_25] : memref<16x1xf32, #tpu.memory_space<vmem>>, vector<16x1xf32>
    %61 = arith.mulf %34, %60 : vector<16x1xf32>
    %cst_26 = arith.constant dense<0.000000e+00> : vector<16xf32>
    %62 = vector.multi_reduction <add>, %49, %cst_26 [1] : vector<16x128xf32> to vector<16xf32>
    %63 = vector.shape_cast %62 : vector<16xf32> to vector<16x1xf32>
    %64 = arith.addf %61, %63 : vector<16x1xf32>
    %c0_27 = arith.constant 0 : index
    %c0_28 = arith.constant 0 : index
    %65 = vector.load %arg9[%c0_27, %c0_28] : memref<16x1xf32, #tpu.memory_space<vmem>>, vector<16x1xf32>
    tpu.vector_store %arg9[%c0_27, %c0_28], %64 {strides = array<i32>} : memref<16x1xf32, #tpu.memory_space<vmem>>, vector<16x1xf32>,
    %c2_i32 = arith.constant 2 : i32
    %66 = arith.cmpi eq, %arg0, %c2_i32 : i32
    %67 = arith.extui %66 : i1 to i32
    %c0_i32_29 = arith.constant 0 : i32
    %68 = arith.cmpi ne, %67, %c0_i32_29 : i32
    scf.if %68 {
      %c0_30 = arith.constant 0 : index
      %c0_31 = arith.constant 0 : index
      %69 = vector.load %arg9[%c0_30, %c0_31] : memref<16x1xf32, #tpu.memory_space<vmem>>, vector<16x1xf32>
      %cst_32 = arith.constant 1.000000e-16 : f32
      %70 = vector.broadcast %cst_32 : f32 to vector<16x1xf32>
      %71 = arith.addf %69, %70 : vector<16x1xf32>
      %cst_33 = arith.constant 1.000000e+00 : f32
      %72 = vector.broadcast %cst_33 : f32 to vector<16x1xf32>
      %73 = arith.divf %72, %71 : vector<16x1xf32>
      %74 = arith.mulf %69, %73 : vector<16x1xf32>
      %c0_34 = arith.constant 0 : index
      %c0_35 = arith.constant 0 : index
      %75 = vector.load %arg2[%c0_34, %c0_35] : memref<16x300xf32, #tpu.memory_space<vmem>>, vector<16x300xf32>
      %cst_36 = arith.constant 0.000000e+00 : f32
      %76 = vector.broadcast %cst_36 : f32 to vector<16x300xf32>
      %77 = arith.cmpf oge, %75, %76 : vector<16x300xf32>
      %cst_37 = arith.constant 0.00999999977 : f32
      %78 = vector.broadcast %cst_37 : f32 to vector<16x300xf32>
      %79 = arith.mulf %78, %75 : vector<16x300xf32>
      %80 = arith.select %77, %75, %79 : vector<16x300xi1>, vector<16x300xf32>
      %81 = vector.broadcast %74 : vector<16x1xf32> to vector<16x300xf32>
      %82 = arith.mulf %80, %81 : vector<16x300xf32>
      %c0_38 = arith.constant 0 : index
      %c0_39 = arith.constant 0 : index
      %83 = vector.load %arg10[%c0_38, %c0_39] : memref<16x400xf32, #tpu.memory_space<vmem>>, vector<16x400xf32>
      %84 = vector.broadcast %73 : vector<16x1xf32> to vector<16x400xf32>
      %85 = arith.mulf %83, %84 : vector<16x400xf32>
      %cst_40 = arith.constant 0.000000e+00 : f32
      %86 = vector.broadcast %cst_40 : f32 to vector<16x68xf32>
      %87 = tpu.concatenate %82, %85, %86 in 1 : vector<16x300xf32>, vector<16x400xf32>, vector<16x68xf32> -> vector<16x768xf32>
      %c0_41 = arith.constant 0 : index
      %c0_42 = arith.constant 0 : index
      %88 = vector.load %arg5[%c0_41, %c0_42] : memref<16x768xf32, #tpu.memory_space<vmem>>, vector<16x768xf32>
      tpu.vector_store %arg5[%c0_41, %c0_42], %87 {strides = array<i32>} : memref<16x768xf32, #tpu.memory_space<vmem>>, vector<16x768xf32>,
    } else {
    }
    return
  }
  func.func @transform_0(%arg0: i32) -> (i32, i32) {
    %c0_i32 = arith.constant 0 : i32
    %c0_i32_0 = arith.constant 0 : i32
    return %c0_i32, %arg0 : i32, i32
  }
  func.func @transform_1(%arg0: i32) -> (i32, i32) {
    %c0_i32 = arith.constant 0 : i32
    %c0_i32_0 = arith.constant 0 : i32
    %c0_i32_1 = arith.constant 0 : i32
    return %c0_i32, %c0_i32_0 : i32, i32
  }
  func.func @transform_2(%arg0: i32) -> (i32, i32) {
    %c0_i32 = arith.constant 0 : i32
    %c0_i32_0 = arith.constant 0 : i32
    %c0_i32_1 = arith.constant 0 : i32
    return %c0_i32, %c0_i32_0 : i32, i32
  }
  func.func @transform_3(%arg0: i32) -> (i32, i32) {
    %c0_i32 = arith.constant 0 : i32
    %c0_i32_0 = arith.constant 0 : i32
    %c0_i32_1 = arith.constant 0 : i32
    return %c0_i32, %c0_i32_0 : i32, i32
  }
  func.func @transform_4(%arg0: i32) -> (i32, i32) {
    %c0_i32 = arith.constant 0 : i32
    %c0_i32_0 = arith.constant 0 : i32
    %c0_i32_1 = arith.constant 0 : i32
    return %c0_i32, %c0_i32_0 : i32, i32
  }
}

</mosaic_0001>

<bundles_post_ra>
// kernel: gat_forward.1
= control target key start
LH: loop header
LB: loop body
LE: loop exit
PB: predicated region body
PF: predicated region fallthrough
CT: control target
= control target key end

     0   :  { %9 = vsyncpa [#allocation8], 0  ;;  %s2224_s0 = inlined_call_operand.hbm [shape: s32[3,384], index: 0, kind: input, shape index: {}]   ;;  %s2225_s1 = inlined_call_operand.hbm [shape: f32[16,300], index: 1, kind: input, shape index: {}]   ;;  %s2226_s2 = inlined_call_operand.hbm [shape: f32[8,100], index: 2, kind: input, shape index: {}]   ;;  %s2227_s3 = inlined_call_operand.hbm [shape: f32[1,400], index: 3, kind: input, shape index: {}]   ;;  %s2228_s4 = inlined_call_operand.hbm [shape: f32[16,768], index: 4, kind: output, shape index: {}]  }
   0x1   :  { %11 = vsyncpa [#allocation8 + $0x1], 0 }
   0x2   :  { %12 = vsyncpa [#allocation11], 0 }
   0x3   :  { %13 = vsyncpa [#allocation14], 0 }
   0x4   :  { %14 = vsyncpa [#allocation9], 0  ;;  %s1805_s15 = smov 0   ;;  %s1807_s16 = smov 0  }
   0x5   :  { %s1809_s17 = smov 0   ;;  %s1811_s18 = smov 0  }
   0x6 LB: > { %s1824_s19 = sadd.s32 4294967295, %s1762_s18   ;;  %p40_p0 = scmp.ne.s32.totalorder %s1754_s16, %s1750_s15  ;;  %s1762_s18 = sphi %s1811_s18, %s2257_s18   ;;  %s1758_s17 = sphi %s1809_s17, %s2256_s17   ;;  %s1754_s16 = sphi %s1807_s16, %s2255_s16   ;;  %s1750_s15 = sphi %s1805_s15, %s2254_s15  }
   0x7   : > { %p2229_p1 = scmp.eq.s32.totalorder %s1824_s19, 0  ;;  %p1345_p2 = scmp.ge.s32.totalorder %s1762_s18, 1 }
   0x8   : > { %p135_p3 = scmp.lt.s32.totalorder %s1762_s18, 4  ;;  %s1764_s22 = smov [#allocation10]  }
   0x9   : > { %p1833_p5 = por %p2229_p1, %p40_p0  ;;  %s147_s23 = sshll.u32 %s1764_s22, 4  ;;  %s1841_s23 = int_to_ptr.vmem [resolvable:$true] %s147_s23 }
   0xa   : > { %p1837_p6 = pnand %p1345_p2, %p135_p3  ;;  %s1765_s25 = smov [#allocation12]  }
   0xb   : > { %s2232_s20 = scalar_select %p1833_p5, 1, 0 }
   0xc   : > { %s2233_s21 = scalar_select %p1837_p6, 1, 0 }
   0xd   : > { %p1492_p7 = pneg %p1837_p6  ;;  %s161_s26 = sshll.u32 %s1765_s25, 4  ;;  %s1851_s26 = int_to_ptr.vmem [resolvable:$true] %s161_s26 }
   0xe   : > { %s1766_s27 = smov [#allocation13]   ;;  %s1576_s5 = scalar_lea.hbm %s2225_s1, 768 }
   0xf   : > { %p1847_p8 = pnand %p1492_p7, %p2229_p1  ;;  %s1853_s28 = sshll.u32 %s1766_s27, 4  ;;  %s173_s28 = int_to_ptr.vmem [resolvable:$true] %s1853_s28 }
  0x10   : > { %p1577_p9 = scmp.ne.s32.totalorder %s2225_s1, %s1576_s5  ;;  %p1583_p13 = scmp.lt.u32.totalorder %s1576_s5, %s2225_s1 }
  0x11   : > { %p1863_p10 = pneg %p1847_p8 }
  0x13   : > { %p1579_p11 = pnand %p1863_p10, %p1577_p9 }
  0x15   : > { %p1580_p12 = pneg %p1579_p11 }
  0x17   : > { %p1585_p0 = pnand %p1583_p13, %p1580_p12 }
  0x19   : > { %1588 = shalt.err (!%p1585_p0)
}
  0x1a   : > { %s1589_s11 = scalar_lea.vmem %s1841_s23, 768  ;;  %p1597_p4 = scmp.lt.s32.totalorder %s1841_s23, %s1841_s23 }
  0x1b   : > { %p1590_p2 = scmp.ne.s32.totalorder %s1841_s23, %s1589_s11  ;;  %p1598_p1 = scmp.lt.s32.totalorder %s1589_s11, %s1589_s11 }
  0x1d   : > { %p1592_p3 = pnand %p1590_p2, %p1863_p10  ;;  %p1599_p9 = por %p1598_p1, %p1597_p4 }
  0x1f   : > { %p1593_p7 = pneg %p1592_p3 }
  0x21   : > { %p1600_p11 = pnand %p1599_p9, %p1593_p7 }
  0x23   : > { %1603 = shalt.err (!%p1600_p11)
}
  0x24   : > { %s1767_s12 = smov 384   ;;  %s1768_s13 = smov 24  }
  0x25   : > { %1495 = dma.hbm_to_vmem [thread:$0]  (!%p1847_p8), %s2225_s1, 768, %s1841_s23, [#allocation11], %s1767_s12, %s1767_s12, %s1768_s13  }
  0x26   : > { %s1604_s27 = scalar_lea.hbm %s2226_s2, 128 }
  0x27   : > { %p1605_p1 = scmp.ne.s32.totalorder %s2226_s2, %s1604_s27  ;;  %p1611_p13 = scmp.lt.u32.totalorder %s1604_s27, %s2226_s2 }
  0x29   : > { %p1607_p4 = pnand %p1605_p1, %p1863_p10 }
  0x2b   : > { %p1608_p12 = pneg %p1607_p4 }
  0x2d   : > { %p1613_p0 = pnand %p1611_p13, %p1608_p12 }
  0x2f   : > { %1616 = shalt.err (!%p1613_p0)
}
  0x30   : > { %s1617_s23 = scalar_lea.vmem %s1851_s26, 128  ;;  %p1625_p9 = scmp.lt.s32.totalorder %s1851_s26, %s1851_s26 }
  0x31   : > { %p1618_p2 = scmp.ne.s32.totalorder %s1851_s26, %s1617_s23  ;;  %p1626_p11 = scmp.lt.s32.totalorder %s1617_s23, %s1617_s23 }
  0x33   : > { %p1620_p3 = pnand %p1618_p2, %p1863_p10  ;;  %p1627_p1 = por %p1626_p11, %p1625_p9 }
  0x35   : > { %p1621_p7 = pneg %p1620_p3 }
  0x37   : > { %p1628_p4 = pnand %p1627_p1, %p1621_p7 }
  0x39   : > { %1631 = shalt.err (!%p1628_p4)
}
  0x3a   : > { %1498 = dma.hbm_to_vmem [thread:$0]  (!%p1847_p8), %s2226_s2, 128, %s1851_s26, [#allocation11]  }
  0x3b   : > { %s1632_s12 = scalar_lea.hbm %s2227_s3, 64 }
  0x3c   : > { %p1633_p12 = scmp.ne.s32.totalorder %s2227_s3, %s1632_s12  ;;  %p1639_p2 = scmp.lt.u32.totalorder %s1632_s12, %s2227_s3 }
  0x3e   : > { %p1635_p13 = pnand %p1633_p12, %p1863_p10 }
  0x40   : > { %p1636_p0 = pneg %p1635_p13 }
  0x42   : > { %p1641_p3 = pnand %p1639_p2, %p1636_p0 }
  0x44   : > { %1644 = shalt.err (!%p1641_p3)
}
  0x45   : > { %s1645_s25 = scalar_lea.vmem %s173_s28, 64  ;;  %p1653_p1 = scmp.lt.s32.totalorder %s173_s28, %s173_s28 }
  0x46   : > { %p1646_p7 = scmp.ne.s32.totalorder %s173_s28, %s1645_s25  ;;  %p1654_p4 = scmp.lt.s32.totalorder %s1645_s25, %s1645_s25 }
  0x48   : > { %p1648_p9 = pnand %p1646_p7, %p1863_p10  ;;  %p1655_p5 = por %p1654_p4, %p1653_p1 }
  0x4a   : > { %p1649_p11 = pneg %p1648_p9 }
  0x4c   : > { %p1656_p6 = pnand %p1655_p5, %p1649_p11 }
  0x4e   : > { %1659 = shalt.err (!%p1656_p6)
}
  0x4f   : > { %1501 = dma.hbm_to_vmem [thread:$0]  (!%p1847_p8), %s2227_s3, 64, %s173_s28, [#allocation14]  }
  0x50   : > { %s1927_s8 = sadd.s32 1, %s1762_s18   ;;  %s27_s30 = sadd.s32 1, %s1758_s17 }
  0x51   : > { %s24_s29 = ssub.s32 %s1762_s18, %s1927_s8  ;;  %p34_p6 = scmp.ne.s32.totalorder %s1758_s17, %s1754_s16 }
  0x52   : > { %p25_p5 = scmp.eq.s32.totalorder %s24_s29, 0  ;;  %p35_p10 = scmp.eq.s32.totalorder %s1762_s18, 0 }
  0x53   : > { %p1509_p12 = scmp.lt.s32.totalorder %s1762_s18, 3  ;;  %s183_s5 = sand.u32 1, %s1758_s17  }
  0x54   : > { %s1937_s24 = scalar_select %p25_p5, %s1758_s17, %s27_s30  }
  0x55   : > { %p36_p13 = por %p35_p10, %p34_p6  ;;  %s1350_s6 = sshll.u32 %s183_s5, 2 }
  0x56   : > { %s1351_s23 = sshll.u32 %s1762_s18, 6  ;;  %s187_s28 = scalar_lea.vmem [#allocation7], %s1350_s6 }
  0x57   : > { %s1944_s10 = scalar_lea.hbm %s2224_s0, %s1351_s23  ;;  %s194_s11 = sshll.u32 %s187_s28, 4  ;;  %s1946_s11 = int_to_ptr.vmem [resolvable:$true] %s194_s11 }
  0x58   : > { %p1948_p8 = pnand %p1509_p12, %p36_p13  ;;  %s184_s18 = scalar_lea.sflag [#allocation8], %s183_s5 }
  0x59   : > { %s1660_s13 = scalar_lea.hbm %s1944_s10, 64  ;;  %s1665_s22 = scalar_lea.hbm %s2224_s0, 192 }
  0x5a   : > { %p1661_p0 = scmp.ne.s32.totalorder %s1944_s10, %s1660_s13  ;;  %p1662_p2 = pneg %p1948_p8 }
  0x5b   : > { %p1666_p9 = scmp.lt.u32.totalorder %s1944_s10, %s2224_s0  ;;  %p1667_p11 = scmp.lt.u32.totalorder %s1665_s22, %s1660_s13 }
  0x5c   : > { %p1663_p3 = pnand %p1662_p2, %p1661_p0  ;;  %p1669_p4 = scmp.lt.u32.totalorder %s1660_s13, %s1944_s10 }
  0x5d   : > { %p1668_p1 = por %p1667_p11, %p1666_p9 }
  0x5e   : > { %p1664_p7 = pneg %p1663_p3 }
  0x5f   : > { %p1670_p5 = por %p1669_p4, %p1668_p1 }
  0x61   : > { %p1671_p6 = pnand %p1670_p5, %p1664_p7 }
  0x63   : > { %1674 = shalt.err (!%p1671_p6)
}
  0x64   : > { %s1675_s27 = scalar_lea.vmem %s1946_s11, 64  ;;  %s1769_s29 = smov [#allocation7]  }
  0x65   : > { %p1676_p10 = scmp.ne.s32.totalorder %s1946_s11, %s1675_s27  ;;  %s1680_s30 = sshll.u32 %s1769_s29, 4  ;;  %s1681_s30 = int_to_ptr.vmem [resolvable:$false] %s1680_s30 }
  0x66   : > { %s1682_s5 = scalar_lea.vmem %s1681_s30, 128  ;;  %p1683_p0 = scmp.lt.s32.totalorder %s1946_s11, %s1681_s30 }
  0x67   : > { %p1678_p12 = pnand %p1676_p10, %p1662_p2  ;;  %p1684_p3 = scmp.lt.s32.totalorder %s1682_s5, %s1675_s27 }
  0x69   : > { %p1679_p13 = pneg %p1678_p12  ;;  %p1685_p9 = por %p1684_p3, %p1683_p0 }
  0x6b   : > { %p1686_p11 = pnand %p1685_p9, %p1679_p13 }
  0x6d   : > { %1689 = shalt.err (!%p1686_p11)
}
  0x6e   : > { %1505 = dma.hbm_to_vmem [thread:$0]  (!%p1948_p8), %s1944_s10, 64, %s1946_s11, %s184_s18  }
  0x6f   : > { %p2237_p7 = scmp.ne.s32.totalorder %s2233_s21, 0 }
  0x70   : > { %s205_s6 = sand.u32 (!%p2237_p7), 1, %s1754_s16   ;;  %p2238_p2 = scmp.ne.s32.totalorder (!%p2237_p7), %s2232_s20, 0 }
  0x71   : > { %203 = sbr.rel (%p2237_p7) target bundleno = 1325 (0x52d), region = 36  ;;  %s1980_s23 = sshll.u32 (!%p2237_p7), %s205_s6, 2 }
  0x72   : > { %s206_s7 = scalar_lea.sflag (!%p2237_p7), [#allocation8], %s205_s6  ;;  %s209_s9 = scalar_lea.vmem (!%p2237_p7), [#allocation7], %s1980_s23 }
  0x78   : > { %1733 = dma.done.wait (%p2238_p2), %s206_s7, 64  }
  0x79   : > { %1735 = vsyncadd (%p2238_p2), %s206_s7, 4294967232  ;;  %p2239_p1 = scmp.eq.s32.totalorder %s1824_s19, 0 }
  0x7b   : > { %1737 = dma.done.wait (%p2239_p1), [#allocation11], 896   ;;  %p2240_p8 = pmov %p2239_p1 }
  0x7c   : > { %p2241_p4 = pmov %p2239_p1 }
  0x7d   : > { %1739 = vsyncadd (%p2240_p8), [#allocation11], 4294966400 }
  0x7e   : > { %1741 = dma.done.wait (%p2241_p4), [#allocation14], 64   ;;  %p2242_p5 = pmov %p2239_p1 }
  0x7f   : > { %p2243_p6 = scmp.ne.s32.totalorder %s1824_s19, 0 }
  0x80   : > { %1743 = vsyncadd (%p2242_p5), [#allocation14], 4294967232  ;;  %v248_v0 = vld [vmem:[#allocation10 + $0x18] sm:$0xff] (!%p2243_p6)  ;;  %v245_v1 = vld [vmem:[#allocation10] sm:$0xff] (!%p2243_p6)  ;;  %s1770_s20 = smov (!%p2243_p6), 100   ;;  %vm310_vm4 = vcmask (!%p2243_p6), 130048   ;;  %v322_v24 = vlaneseq (!%p2243_p6) }
  0x81   : > { %244 = sbr.rel (%p2243_p6) target bundleno = 410 (0x19a), region = 56  ;;  %v249_v2 = vld [vmem:[#allocation10 + $0x20] sm:$0xff] (!%p2243_p6)  ;;  %vm254_vm0 = vcmp.ge.f32.partialorder (!%p2243_p6), %v248_v0, 0.0  ;;  %v260_v3 = vmul.f32 (!%p2243_p6), 0.01, %v248_v0  ;;  %vm251_vm1 = vcmp.ge.f32.partialorder (!%p2243_p6), %v245_v1, 0.0 }
  0x82   : > { %v257_v4 = vmul.f32 (!%p2243_p6), 0.01, %v245_v1  ;;  %vm255_vm2 = vcmp.ge.f32.partialorder (!%p2243_p6), %v249_v2, 0.0  ;;  %v261_v5 = vmul.f32 (!%p2243_p6), 0.01, %v249_v2  ;;  %v246_v6 = vld [vmem:[#allocation10 + $0x8] sm:$0xff] (!%p2243_p6) }
  0x83   : > { %v250_v7 = vld [vmem:[#allocation10 + $0x28] sm:$0xff] (!%p2243_p6)  ;;  %v247_v8 = vld [vmem:[#allocation10 + $0x10] sm:$0xff] (!%p2243_p6)  ;;  %v266_v9 = vsel (!%p2243_p6), %vm254_vm0, %v248_v0, %v260_v3  ;;  %vm252_vm3 = vcmp.ge.f32.partialorder (!%p2243_p6), %v246_v6, 0.0  ;;  %v258_v11 = vmul.f32 (!%p2243_p6), 0.01, %v246_v6  ;;  %v1771_v17 = vmov (!%p2243_p6), 0.0  }
  0x84   : > { %v263_v10 = vsel (!%p2243_p6), %vm251_vm1, %v245_v1, %v257_v4  ;;  %v269_v12 = vld [vmem:[#allocation12] sm:$0xff] (!%p2243_p6)  ;;  %285 = vrot.lane.b32.xlu1 (!%p2243_p6), %v266_v9, %s1770_s20  ;;  %v267_v13 = vsel (!%p2243_p6), %vm255_vm2, %v249_v2, %v261_v5  ;;  %v262_v15 = vmul.f32 (!%p2243_p6), 0.01, %v250_v7  ;;  %v259_v16 = vmul.f32 (!%p2243_p6), 0.01, %v247_v8  ;;  %317 = vst [vmem:[#allocation2 + $0x48] sm:$0xff] (!%p2243_p6), %v1771_v17 }
  0x85   : > { %279 = vrot.lane.b32.xlu0 (!%p2243_p6), %v263_v10, %s1770_s20  ;;  %v264_v14 = vsel (!%p2243_p6), %vm252_vm3, %v246_v6, %v258_v11  ;;  %vm256_vm5 = vcmp.ge.f32.partialorder (!%p2243_p6), %v250_v7, 0.0  ;;  %vm253_vm6 = vcmp.ge.f32.partialorder (!%p2243_p6), %v247_v8, 0.0  ;;  %318 = vst [vmem:[#allocation2 + $0x50] sm:$0xff] (!%p2243_p6), %v1771_v17  ;;  %319 = vst.msk [vmem:[#allocation2 + $0x58] sm:$0xff] (!%p2243_p6), %vm310_vm4, %v1771_v17  ;;  %vm270_vm7 = vcmp.ge.f32.partialorder (!%p2243_p6), %v269_v12, 0.0 }
  0x86   : > { %380 = vst [vmem:[#allocation6] sm:$0xff] (!%p2243_p6), %v1771_v17  ;;  %381 = vst [vmem:[#allocation6 + $0x8] sm:$0xff] (!%p2243_p6), %v1771_v17  ;;  %v271_v18 = vmul.f32 (!%p2243_p6), 0.01, %v269_v12  ;;  %vm291_vm8 = vcmask (!%p2243_p6), 818176   ;;  %v268_v20 = vsel (!%p2243_p6), %vm256_vm5, %v250_v7, %v262_v15  ;;  %v265_v21 = vsel (!%p2243_p6), %vm253_vm6, %v247_v8, %v259_v16 }
  0x87   : > { %382 = vst [vmem:[#allocation6 + $0x10] sm:$0xff] (!%p2243_p6), %v1771_v17  ;;  %383 = vst.msk [vmem:[#allocation6 + $0x18] sm:$0xff] (!%p2243_p6), %vm310_vm4, %v1771_v17  ;;  %vm372_vm9 = vcmask (!%p2243_p6), 7168   ;;  %v1772_v23 = vmov (!%p2243_p6), -1e+30   ;;  %v323_v25 = vshrl.u32 (!%p2243_p6), %v322_v24, 7 }
  0x88   : > { %384 = vst [vmem:[#allocation6 + $0x20] sm:$0xff] %v1771_v17  ;;  %385 = vst [vmem:[#allocation6 + $0x28] sm:$0xff] %v1771_v17  ;;  %287 = vrot.lane.b32.xlu1 %v267_v13, %s1770_s20  ;;  %v272_v19 = vsel %vm270_vm7, %v269_v12, %v271_v18  ;;  %v320_v28 = vld [vmem:[#allocation13] sm:$0xf] }
  0x89   : > { %386 = vst [vmem:[#allocation6 + $0x30] sm:$0xff] %v1771_v17  ;;  %387 = vst.msk [vmem:[#allocation6 + $0x38] sm:$0xff] %vm310_vm4, %v1771_v17  ;;  %281 = vrot.lane.b32.xlu0 %v264_v14, %s1770_s20  ;;  %v306_v22 = vsel %vm291_vm8, %v272_v19, 0.0  ;;  %v324_v26 = vsub.s32 0, %v323_v25  ;;  %v328_v27 = vsub.s32 1, %v323_v25  ;;  %v336_v33 = vsub.s32 3, %v323_v25 }
  0x8a   : > { %316 = vst [vmem:[#allocation2 + $0x40] sm:$0xff] %v306_v22  ;;  %376 = vst.msk [vmem:[#allocation4] sm:$0xff] %vm372_vm9, %v1772_v23  ;;  %v332_v36 = vsub.s32 2, %v323_v25 }
  0x8b   : > { %377 = vst.msk [vmem:[#allocation4 + $0x8] sm:$0xff] %vm372_vm9, %v1772_v23  ;;  %378 = vst.msk [vmem:[#allocation5] sm:$0xff] %vm372_vm9, %v1771_v17  ;;  %v325_v34 = vrot.slane %v320_v28, %v324_v26  ;;  %v329_v35 = vrot.slane %v320_v28, %v328_v27  ;;  %v337_v43 = vrot.slane %v320_v28, %v336_v33 }
  0x8c   : > { %379 = vst.msk [vmem:[#allocation5 + $0x8] sm:$0xff] %vm372_vm9, %v1771_v17  ;;  %289 = vrot.lane.b32.xlu1 %v268_v20, %s1770_s20  ;;  %v333_v47 = vrot.slane %v320_v28, %v332_v36 }
  0x8d   : > { %283 = vrot.lane.b32.xlu0 %v265_v21, %s1770_s20  ;;  %v350_v39 = vmul.f32 %v325_v34, %v306_v22  ;;  %v351_v40 = vmul.f32 0.0, %v329_v35  ;;  %v353_v52 = vmul.f32 0.0, %v337_v43 }
  0x8e   : > { %v352_v51 = vmul.f32 0.0, %v333_v47 }
  0x8f   : > { %v366_v53 = vadd.f32 %v351_v40, %v350_v39  ;;  %v368_v3 = vsel %vm310_vm4, %v353_v52, 0.0 }
  0x91   : > { %v367_v1 = vadd.f32 %v366_v53, %v352_v51 }
  0x93   : > { %v369_v6 = vadd.f32 %v368_v3, %v367_v1 }
  0xf6   : > { %v286_v29 = vpop.permute.xlu1 %285 }
  0xf7   : > { %v280_v30 = vpop.permute.xlu0 %279  ;;  %v305_v31 = vsel %vm291_vm8, 0.0, %v286_v29 }
  0xf8   : > { %v304_v32 = vsel %vm291_vm8, 0.0, %v280_v30  ;;  %312 = vst [vmem:[#allocation2 + $0x20] sm:$0xff] %v305_v31  ;;  %v346_v44 = vmul.f32 %v325_v34, %v305_v31 }
  0xf9   : > { %307 = vst [vmem:[#allocation2] sm:$0xff] %v304_v32  ;;  %v342_v48 = vmul.f32 %v325_v34, %v304_v32 }
  0xfa   : > { %v288_v37 = vpop.permute.xlu1 %287 }
  0xfb   : > { %v282_v38 = vpop.permute.xlu0 %281  ;;  %v294_v41 = vsel %vm291_vm8, %v286_v29, %v288_v37 }
  0xfc   : > { %v292_v42 = vsel %vm291_vm8, %v280_v30, %v282_v38  ;;  %313 = vst [vmem:[#allocation2 + $0x28] sm:$0xff] %v294_v41  ;;  %v347_v45 = vmul.f32 %v329_v35, %v294_v41 }
  0xfd   : > { %308 = vst [vmem:[#allocation2 + $0x8] sm:$0xff] %v292_v42  ;;  %v343_v46 = vmul.f32 %v329_v35, %v292_v42 }
  0xfe   : > { %v290_v49 = vpop.permute.xlu1 %289  ;;  %v360_v58 = vadd.f32 %v347_v45, %v346_v44 }
  0xff   : > { %v284_v50 = vpop.permute.xlu0 %283  ;;  %v295_v54 = vsel %vm291_vm8, %v288_v37, %v290_v49  ;;  %315 = vst.msk [vmem:[#allocation2 + $0x38] sm:$0xff] %vm310_vm4, %v290_v49  ;;  %v349_v55 = vmul.f32 %v337_v43, %v290_v49  ;;  %v354_v59 = vadd.f32 %v343_v46, %v342_v48 }
 0x100   : > { %v293_v56 = vsel %vm291_vm8, %v282_v38, %v284_v50  ;;  %311 = vst.msk [vmem:[#allocation2 + $0x18] sm:$0xff] %vm310_vm4, %v284_v50  ;;  %v345_v57 = vmul.f32 %v337_v43, %v284_v50  ;;  %314 = vst [vmem:[#allocation2 + $0x30] sm:$0xff] %v295_v54  ;;  %v348_v60 = vmul.f32 %v333_v47, %v295_v54 }
 0x101   : > { %309 = vst [vmem:[#allocation2 + $0x10] sm:$0xff] %v293_v56  ;;  %v344_v61 = vmul.f32 %v333_v47, %v293_v56  ;;  %v362_v62 = vsel %vm310_vm4, %v349_v55, 0.0 }
 0x102   : > { %v361_v63 = vadd.f32 %v360_v58, %v348_v60  ;;  %v356_v2 = vsel %vm310_vm4, %v345_v57, 0.0 }
 0x103   : > { %v355_v0 = vadd.f32 %v354_v59, %v344_v61 }
 0x104   : > { %v363_v4 = vadd.f32 %v362_v62, %v361_v63 }
 0x105   : > { %v357_v5 = vadd.f32 %v356_v2, %v355_v0 }
 0x106   : > { %364 = vadd.xlane.f32.xlu1 %v363_v4 }
 0x107   : > { %358 = vadd.xlane.f32.xlu0 %v357_v5 }
 0x10b   : > { %370 = vadd.xlane.f32.xlu0 %v369_v6 }
 0x193   : > { %v365_v7 = vpop.xlane.xlu1 %364 }
 0x194   : > { %v359_v8 = vpop.xlane.xlu0 %358  ;;  %374 = vst.msk [vmem:[#allocation3 + $0x8] sm:$0xff] %vm372_vm9, %v365_v7 }
 0x195   : > { %373 = vst.msk [vmem:[#allocation3] sm:$0xff] %vm372_vm9, %v359_v8 }
 0x198   : > { %v371_v9 = vpop.xlane.xlu0 %370 }
 0x199   : > { %375 = vst.msk [vmem:[#allocation3 + $0x10] sm:$0xff] %vm372_vm9, %v371_v9 }
 0x19a PF: > { %v389_v11 = vlaneseq  ;;  %v1773_v12 = vmov 0   ;;  %v388_v13 = vld [vmem:[%s209_s9] sm:$0x7]  ;;  %v1774_v14 = vmov 0.0   ;;  %v497_v35 = vld [vmem:[#allocation2 + $0x8] sm:$0xff]  ;;  %v496_v40 = vld [vmem:[#allocation2] sm:$0xff] }
 0x19b   : > { %1562 = vset.pattern.permute.xlu1 %v1773_v12  ;;  %653 = vmatprep.mubr.f32.mxu0 %v1774_v14  ;;  %v406_v16 = vadd.s32 16, %v388_v13  ;;  %v418_v17 = vld [vmem:[#allocation3 + $0x8] sm:$0xff]  ;;  %v499_v37 = vld [vmem:[#allocation2 + $0x18] sm:$0xff]  ;;  %v500_v41 = vld [vmem:[#allocation2 + $0x20] sm:$0xff]  ;;  %vm540_vm5 = vcmask 195584   ;;  %vm462_vm6 = vcmask 7168  }
 0x19c   : > { %v417_v10 = vld [vmem:[#allocation3] sm:$0xff]  ;;  %v390_v15 = vshrl.u32 %v389_v11, 7  ;;  %814 = vmatprep.mubr.f32.mxu1 %v1774_v14  ;;  %v501_v36 = vld [vmem:[#allocation2 + $0x28] sm:$0xff]  ;;  %v503_v39 = vld [vmem:[#allocation2 + $0x38] sm:$0xff]  ;;  %v1404_v43 = vpack.c.bf16 %v500_v41, %v496_v40  ;;  %vm1102_vm7 = vcmask 130048   ;;  %p1397_p10 = scmp.ne.s32.totalorder %s1824_s19, 2 }
 0x19d   : > { %422 = vperm.xlu1 %1562, %v417_v10   ;;  %v1402_v38 = vpack.c.bf16 %v501_v36, %v497_v35  ;;  %v1406_v42 = vpack.c.bf16 %v503_v39, %v499_v37  ;;  %v498_v44 = vld [vmem:[#allocation2 + $0x10] sm:$0xff]  ;;  %v505_v46 = vld [vmem:[#allocation2 + $0x48] sm:$0xff]  ;;  %v504_v49 = vld [vmem:[#allocation2 + $0x40] sm:$0xff]  ;;  %s1776_s21 = smov (!%p1397_p10), 44  }
 0x19e   : > { %v401_v18 = vsub.s32 1, %v390_v15  ;;  %v409_v19 = vsub.s32 2, %v390_v15  ;;  %v391_v20 = vadd.s32 8, %v390_v15  ;;  %v392_v23 = vadd.s32 16, %v390_v15  ;;  %v502_v45 = vld [vmem:[#allocation2 + $0x30] sm:$0xff]  ;;  %v507_v48 = vld [vmem:[#allocation2 + $0x58] sm:$0xff] }
 0x19f   : > { %v395_v31 = vsub.s32 0, %v390_v15  ;;  %1403 = vmatprep.subr.bf16.mxu0 %v1402_v38  ;;  %v1408_v47 = vpack.c.bf16 %v502_v45, %v498_v44  ;;  %1407 = vmatprep.subr.bf16.mxu1 %v1406_v42  ;;  %v506_v50 = vld [vmem:[#allocation2 + $0x50] sm:$0xff] }
 0x1a0   : > { %v402_v21 = vrot.slane %v388_v13, %v401_v18  ;;  %v410_v22 = vrot.slane %v406_v16, %v409_v19  ;;  %v419_v24 = vld [vmem:[#allocation3 + $0x10] sm:$0xff]  ;;  %1405 = vmatpush1.bf16.msra.mxu0 %v1404_v43 }
 0x1a1   : > { %427 = vperm.xlu1 %1562, %v418_v17   ;;  %v396_v32 = vrot.slane %v388_v13, %v395_v31  ;;  %1409 = vmatpush1.bf16.msra.mxu1 %v1408_v47 }
 0x1a2   : > { %vm403_vm10 = vcmp.eq.s32.totalorder %v390_v15, %v402_v21  ;;  %vm411_vm11 = vcmp.eq.s32.totalorder %v390_v15, %v410_v22  ;;  %vm404_vm12 = vcmp.eq.s32.totalorder %v391_v20, %v402_v21  ;;  %vm412_vm13 = vcmp.eq.s32.totalorder %v391_v20, %v410_v22  ;;  %593 = vmatprep.subr.mxu0 %v505_v46 }
 0x1a3   : > { %vm2031_vm14 = vmor %vm403_vm10, %vm411_vm11  ;;  %vm405_vm0 = vcmp.eq.s32.totalorder %v392_v23, %v402_v21  ;;  %vm413_vm1 = vcmp.eq.s32.totalorder %v392_v23, %v410_v22  ;;  %vm2052_vm3 = vcmp.eq.s32.totalorder %v391_v20, %v396_v32  ;;  %vm2056_vm4 = vcmp.eq.s32.totalorder %v390_v15, %v396_v32  ;;  %754 = vmatprep.subr.mxu1 %v507_v48  ;;  %v2138_v20 = vld [vmem:[#allocation4 + $0x8] sm:$0xff]  ;;  %v452_v21 = vld [vmem:[#allocation4] sm:$0xff] }
 0x1a4   : > { %v1358_v26 = vsel %vm2031_vm14, 1.0, %v1774_v14  ;;  %vm2038_vm15 = vmor %vm404_vm12, %vm412_vm13  ;;  %594 = vmatpush1.msra.mxu0 %v504_v49  ;;  %vm1224_vm12 = vcmask (!%p1397_p10), 359424   ;;  %vm1241_vm13 = vcmask (!%p1397_p10), 490496  }
 0x1a5   : > { %432 = vperm.xlu1 %1562, %v419_v24   ;;  %508 = vxpose.xlu0.b32.start [1/3] (short) %v1358_v26, 128  ;;  %v1359_v28 = vsel %vm2038_vm15, 1.0, %v1774_v14  ;;  %vm2045_vm2 = vmor %vm405_vm0, %vm413_vm1 }
 0x1a6   : > { %v1360_v30 = vsel %vm2045_vm2, 1.0, %v1774_v14  ;;  %755 = vmatpush1.msra.mxu1 %v506_v50 }
 0x1a9   : > { %509 = vxpose.xlu0.b32.cont [2/3] (short) %v1359_v28, 128 }
 0x1ad   : > { %510 = vxpose.xlu0.b32.end [3/3] (short) %v1360_v30, 128 }
 0x1d6   : > { %1563 = vset.pattern.permute.xlu0 %v1773_v12 }
 0x21c   : > { %v423_v51 = vpop.permute.xlu1 %422 }
 0x21d   : > { %v435_v54 = vsel %vm2031_vm14, %v423_v51, 0.0 }
 0x220   : > { %v428_v52 = vpop.permute.xlu1 %427 }
 0x221   : > { %v436_v53 = vsel %vm2038_vm15, %v428_v52, 0.0 }
 0x222   : > { %v438_v55 = vadd.f32 %v436_v53, %v435_v54 }
 0x224   : > { %v433_v56 = vpop.permute.xlu1 %432 }
 0x225   : > { %v437_v57 = vsel %vm2045_vm2, %v433_v56, 0.0  ;;  %v524_v59 = vpop.trf.xlu0 }
 0x226   : > { %v439_v58 = vadd.f32 %v438_v55, %v437_v57  ;;  %1361 = vmatmul.mubr.msk.f32.vlgmr.msra.gmra.mrb[0].mxu0 %vm540_vm5, %v524_v59  ;;  %1377 = vmatmul.mubr.msk.f32.vlgmr.msra.gmra.mrb[0].mxu1 %vm540_vm5, %v524_v59 }
 0x227   : > { %659 = vmatprep.mubr.f32.mxu0 %v1774_v14  ;;  %820 = vmatprep.mubr.f32.mxu1 %v1774_v14 }
 0x228   : > { %v440_v60 = vrot.slane %v439_v58, 4 }
 0x229   : > { %v525_v62 = vpop.trf.xlu0 }
 0x22a   : > { %v441_v61 = vadd.f32 %v440_v60, %v439_v58  ;;  %1362 = vmatmul.mubr.msk.f32.gmra.mrb[2].mxu0 %vm540_vm5, %v525_v62  ;;  %1378 = vmatmul.mubr.msk.f32.gmra.mrb[2].mxu1 %vm540_vm5, %v525_v62 }
 0x22b   : > { %665 = vmatprep.mubr.f32.mxu0 %v1774_v14  ;;  %826 = vmatprep.mubr.f32.mxu1 %v1774_v14 }
 0x22c   : > { %v442_v63 = vrot.slane %v441_v61, 2 }
 0x22d   : > { %v526_v1 = vpop.trf.xlu0 }
 0x22e   : > { %v443_v0 = vadd.f32 %v442_v63, %v441_v61  ;;  %1363 = vmatmul.mubr.msk.f32.gmra.mrb[4].mxu0 %vm540_vm5, %v526_v1  ;;  %1379 = vmatmul.mubr.msk.f32.gmra.mrb[4].mxu1 %vm540_vm5, %v526_v1 }
 0x22f   : > { %671 = vmatprep.mubr.f32.mxu0 %v1774_v14  ;;  %832 = vmatprep.mubr.f32.mxu1 %v1774_v14 }
 0x230   : > { %v444_v2 = vrot.slane %v443_v0, 1 }
 0x231   : > { %v527_v4 = vpop.trf.xlu0 }
 0x232   : > { %v2078_v3 = vadd.f32 %v444_v2, %v443_v0  ;;  %1364 = vmatmul.mubr.msk.f32.gmra.mrb[6].mxu0 %vm540_vm5, %v527_v4  ;;  %1380 = vmatmul.mubr.msk.f32.gmra.mrb[6].mxu1 %vm540_vm5, %v527_v4 }
 0x233   : > { %677 = vmatprep.mubr.f32.mxu0 %v1774_v14  ;;  %838 = vmatprep.mubr.f32.mxu1 %v1774_v14 }
 0x234   : > { %v447_v5 = vsel %vm2052_vm3, %v2078_v3, -1e+30  ;;  %v446_v6 = vsel %vm2056_vm4, %v2078_v3, -1e+30 }
 0x235   : > { %450 = vmax.xlane.f32.xlu1 %v447_v5  ;;  %448 = vmax.xlane.f32.xlu0 %v446_v6  ;;  %v528_v7 = vpop.trf.xlu0 }
 0x236   : > { %1365 = vmatmul.mubr.msk.f32.gmra.mrb[8].mxu0 %vm540_vm5, %v528_v7  ;;  %1381 = vmatmul.mubr.msk.f32.gmra.mrb[8].mxu1 %vm540_vm5, %v528_v7 }
 0x237   : > { %683 = vmatprep.mubr.f32.mxu0 %v1774_v14  ;;  %844 = vmatprep.mubr.f32.mxu1 %v1774_v14 }
 0x239   : > { %v529_v8 = vpop.trf.xlu0 }
 0x23a   : > { %1366 = vmatmul.mubr.msk.f32.gmra.mrb[10].mxu0 %vm540_vm5, %v529_v8  ;;  %1382 = vmatmul.mubr.msk.f32.gmra.mrb[10].mxu1 %vm540_vm5, %v529_v8 }
 0x23b   : > { %689 = vmatprep.mubr.f32.mxu0 %v1774_v14  ;;  %850 = vmatprep.mubr.f32.mxu1 %v1774_v14 }
 0x23d   : > { %v530_v9 = vpop.trf.xlu0 }
 0x23e   : > { %1367 = vmatmul.mubr.msk.f32.gmra.mrb[12].mxu0 %vm540_vm5, %v530_v9  ;;  %1383 = vmatmul.mubr.msk.f32.gmra.mrb[12].mxu1 %vm540_vm5, %v530_v9 }
 0x23f   : > { %695 = vmatprep.mubr.f32.mxu0 %v1774_v14  ;;  %856 = vmatprep.mubr.f32.mxu1 %v1774_v14 }
 0x241   : > { %v531_v10 = vpop.trf.xlu0 }
 0x242   : > { %1368 = vmatmul.mubr.msk.f32.gmra.mrb[14].mxu0 %vm540_vm5, %v531_v10  ;;  %1384 = vmatmul.mubr.msk.f32.gmra.mrb[14].mxu1 %vm540_vm5, %v531_v10 }
 0x243   : > { %701 = vmatprep.mubr.f32.mxu0 %v1774_v14  ;;  %862 = vmatprep.mubr.f32.mxu1 %v1774_v14 }
 0x245   : > { %v532_v11 = vpop.trf.xlu0 }
 0x246   : > { %1369 = vmatmul.mubr.msk.f32.gmra.mrb[16].mxu0 %vm540_vm5, %v532_v11  ;;  %1385 = vmatmul.mubr.msk.f32.gmra.mrb[16].mxu1 %vm540_vm5, %v532_v11 }
 0x247   : > { %707 = vmatprep.mubr.f32.mxu0 %v1774_v14  ;;  %868 = vmatprep.mubr.f32.mxu1 %v1774_v14 }
 0x249   : > { %v533_v12 = vpop.trf.xlu0 }
 0x24a   : > { %1370 = vmatmul.mubr.msk.f32.gmra.mrb[18].mxu0 %vm540_vm5, %v533_v12  ;;  %1386 = vmatmul.mubr.msk.f32.gmra.mrb[18].mxu1 %vm540_vm5, %v533_v12 }
 0x24b   : > { %713 = vmatprep.mubr.f32.mxu0 %v1774_v14  ;;  %874 = vmatprep.mubr.f32.mxu1 %v1774_v14 }
 0x24d   : > { %v534_v13 = vpop.trf.xlu0 }
 0x24e   : > { %1371 = vmatmul.mubr.msk.f32.gmra.mrb[20].mxu0 %vm540_vm5, %v534_v13  ;;  %1387 = vmatmul.mubr.msk.f32.gmra.mrb[20].mxu1 %vm540_vm5, %v534_v13 }
 0x24f   : > { %719 = vmatprep.mubr.f32.mxu0 %v1774_v14  ;;  %880 = vmatprep.mubr.f32.mxu1 %v1774_v14 }
 0x251   : > { %v535_v15 = vpop.trf.xlu0 }
 0x252   : > { %1372 = vmatmul.mubr.msk.f32.gmra.mrb[22].mxu0 %vm540_vm5, %v535_v15  ;;  %1388 = vmatmul.mubr.msk.f32.gmra.mrb[22].mxu1 %vm540_vm5, %v535_v15 }
 0x253   : > { %725 = vmatprep.mubr.f32.mxu0 %v1774_v14  ;;  %886 = vmatprep.mubr.f32.mxu1 %v1774_v14 }
 0x255   : > { %v536_v16 = vpop.trf.xlu0 }
 0x256   : > { %1373 = vmatmul.mubr.msk.f32.gmra.mrb[24].mxu0 %vm540_vm5, %v536_v16  ;;  %1389 = vmatmul.mubr.msk.f32.gmra.mrb[24].mxu1 %vm540_vm5, %v536_v16 }
 0x257   : > { %731 = vmatprep.mubr.f32.mxu0 %v1774_v14  ;;  %892 = vmatprep.mubr.f32.mxu1 %v1774_v14 }
 0x259   : > { %v537_v17 = vpop.trf.xlu0 }
 0x25a   : > { %1374 = vmatmul.mubr.msk.f32.gmra.mrb[26].mxu0 %vm540_vm5, %v537_v17  ;;  %1390 = vmatmul.mubr.msk.f32.gmra.mrb[26].mxu1 %vm540_vm5, %v537_v17 }
 0x25b   : > { %737 = vmatprep.mubr.f32.mxu0 %v1774_v14  ;;  %898 = vmatprep.mubr.f32.mxu1 %v1774_v14 }
 0x25d   : > { %v538_v18 = vpop.trf.xlu0 }
 0x25e   : > { %1375 = vmatmul.mubr.msk.f32.gmra.mrb[28].mxu0 %vm540_vm5, %v538_v18  ;;  %1391 = vmatmul.mubr.msk.f32.gmra.mrb[28].mxu1 %vm540_vm5, %v538_v18 }
 0x25f   : > { %743 = vmatprep.mubr.f32.mxu0 %v1774_v14  ;;  %904 = vmatprep.mubr.f32.mxu1 %v1774_v14 }
 0x261   : > { %v539_v19 = vpop.trf.xlu0 }
 0x262   : > { %1376 = vmatmul.mubr.msk.f32.gmra.mrb[30].mxu0 %vm540_vm5, %v539_v19  ;;  %1392 = vmatmul.mubr.msk.f32.gmra.mrb[30].mxu1 %vm540_vm5, %v539_v19 }
 0x263   : > { %1001 = vmatprep.mubr.f32.mxu0 %v1774_v14  ;;  %1078 = vmatprep.mubr.f32.mxu1 %v1774_v14 }
 0x2c2   : > { %v451_v22 = vpop.xlane.xlu1 %450  ;;  %v449_v23 = vpop.xlane.xlu0 %448 }
 0x2c3   : > { %v2141_v24 = vmax.f32 %v2138_v20, %v451_v22  ;;  %v454_v25 = vmax.f32 %v452_v21, %v449_v23 }
 0x2c5   : > { %v457_v26 = vsub.f32 %v2138_v20, %v2141_v24  ;;  %464 = vst.msk [vmem:[#allocation4 + $0x8] sm:$0xff] %vm462_vm6, %v2141_v24  ;;  %v456_v27 = vsub.f32 %v452_v21, %v454_v25  ;;  %463 = vst.msk [vmem:[#allocation4] sm:$0xff] %vm462_vm6, %v454_v25  ;;  %467 = vperm.xlu1 %1562, %v454_v25   ;;  %v913_v20 = vld [vmem:[#allocation6 + $0x10] sm:$0xff] }
 0x2c7   : > { %v458_v28 = vmul.f32 1.442695, %v456_v27  ;;  %v460_v34 = vmul.f32 1.442695, %v457_v26  ;;  %v914_v26 = vld [vmem:[#allocation6 + $0x18] sm:$0xff] }
 0x2c9   : > { %472 = vperm.xlu1 %1562, %v2141_v24   ;;  %1564 = vpow2.f32 %v458_v28  ;;  %v912_v24 = vld [vmem:[#allocation6 + $0x8] sm:$0xff] }
 0x2d3   : > { %v2149_v29 = vpop.eup %1564 }
 0x2d4   : > { %921 = vperm.xlu0 %1563, %v2149_v29  }
 0x2f9   : > { %v655_v30 = vpop.f32.mrb[0].mxu0  ;;  %v816_v31 = vpop.f32.mrb[0].mxu1 }
 0x2fa   : > { %v657_v32 = vpop.f32.mrb[1].mxu0  ;;  %v818_v35 = vpop.f32.mrb[1].mxu1 }
 0x2fd   : > { %v661_v36 = vpop.f32.mrb[2].mxu0  ;;  %v822_v37 = vpop.f32.mrb[2].mxu1 }
 0x2fe   : > { %v1412_v38 = vpack.c.bf16 %v661_v36, %v655_v30  ;;  %v1444_v39 = vpack.c.bf16 %v822_v37, %v816_v31  ;;  %v663_v40 = vpop.f32.mrb[3].mxu0  ;;  %v824_v41 = vpop.f32.mrb[3].mxu1 }
 0x2ff   : > { %v1410_v42 = vpack.c.bf16 %v663_v40, %v657_v32  ;;  %v1442_v43 = vpack.c.bf16 %v824_v41, %v818_v35 }
 0x301   : > { %1411 = vmatprep.subr.bf16.mxu0 %v1410_v42  ;;  %1443 = vmatprep.subr.bf16.mxu1 %v1442_v43  ;;  %v667_v44 = vpop.f32.mrb[4].mxu0  ;;  %v828_v45 = vpop.f32.mrb[4].mxu1 }
 0x302   : > { %1413 = vmatpush1.bf16.msra.mxu0 %v1412_v38  ;;  %1445 = vmatpush1.bf16.msra.mxu1 %v1444_v39  ;;  %v669_v46 = vpop.f32.mrb[5].mxu0  ;;  %v830_v47 = vpop.f32.mrb[5].mxu1 }
 0x305   : > { %v673_v48 = vpop.f32.mrb[6].mxu0  ;;  %v834_v49 = vpop.f32.mrb[6].mxu1 }
 0x306   : > { %v1416_v50 = vpack.c.bf16 %v673_v48, %v667_v44  ;;  %v1448_v51 = vpack.c.bf16 %v834_v49, %v828_v45  ;;  %v675_v52 = vpop.f32.mrb[7].mxu0  ;;  %v836_v53 = vpop.f32.mrb[7].mxu1 }
 0x307   : > { %v1414_v54 = vpack.c.bf16 %v675_v52, %v669_v46  ;;  %v1446_v55 = vpack.c.bf16 %v836_v53, %v830_v47 }
 0x309   : > { %1415 = vmatprep.subr.bf16.mxu0 %v1414_v54  ;;  %1447 = vmatprep.subr.bf16.mxu1 %v1446_v55  ;;  %v679_v56 = vpop.f32.mrb[8].mxu0  ;;  %v840_v57 = vpop.f32.mrb[8].mxu1 }
 0x30a   : > { %1417 = vmatpush1.bf16.msra.mxu0 %v1416_v50  ;;  %1449 = vmatpush1.bf16.msra.mxu1 %v1448_v51  ;;  %v681_v58 = vpop.f32.mrb[9].mxu0  ;;  %v842_v59 = vpop.f32.mrb[9].mxu1 }
 0x30d   : > { %v685_v60 = vpop.f32.mrb[10].mxu0  ;;  %v846_v61 = vpop.f32.mrb[10].mxu1 }
 0x30e   : > { %v1420_v62 = vpack.c.bf16 %v685_v60, %v679_v56  ;;  %v1452_v63 = vpack.c.bf16 %v846_v61, %v840_v57  ;;  %v687_v0 = vpop.f32.mrb[11].mxu0  ;;  %v848_v1 = vpop.f32.mrb[11].mxu1 }
 0x30f   : > { %v1418_v2 = vpack.c.bf16 %v687_v0, %v681_v58  ;;  %v1450_v4 = vpack.c.bf16 %v848_v1, %v842_v59 }
 0x311   : > { %1419 = vmatprep.subr.bf16.mxu0 %v1418_v2  ;;  %1451 = vmatprep.subr.bf16.mxu1 %v1450_v4  ;;  %v691_v5 = vpop.f32.mrb[12].mxu0  ;;  %v852_v6 = vpop.f32.mrb[12].mxu1 }
 0x312   : > { %1421 = vmatpush1.bf16.msra.mxu0 %v1420_v62  ;;  %1453 = vmatpush1.bf16.msra.mxu1 %v1452_v63  ;;  %v693_v7 = vpop.f32.mrb[13].mxu0  ;;  %v854_v8 = vpop.f32.mrb[13].mxu1 }
 0x315   : > { %v697_v9 = vpop.f32.mrb[14].mxu0  ;;  %v858_v10 = vpop.f32.mrb[14].mxu1 }
 0x316   : > { %v1424_v11 = vpack.c.bf16 %v697_v9, %v691_v5  ;;  %v1456_v12 = vpack.c.bf16 %v858_v10, %v852_v6  ;;  %v699_v13 = vpop.f32.mrb[15].mxu0  ;;  %v860_v15 = vpop.f32.mrb[15].mxu1 }
 0x317   : > { %v1422_v16 = vpack.c.bf16 %v699_v13, %v693_v7  ;;  %v1454_v17 = vpack.c.bf16 %v860_v15, %v854_v8 }
 0x319   : > { %1423 = vmatprep.subr.bf16.mxu0 %v1422_v16  ;;  %1455 = vmatprep.subr.bf16.mxu1 %v1454_v17  ;;  %v703_v18 = vpop.f32.mrb[16].mxu0  ;;  %v864_v19 = vpop.f32.mrb[16].mxu1 }
 0x31a   : > { %1425 = vmatpush1.bf16.msra.mxu0 %v1424_v11  ;;  %1457 = vmatpush1.bf16.msra.mxu1 %v1456_v12  ;;  %v705_v21 = vpop.f32.mrb[17].mxu0  ;;  %v866_v22 = vpop.f32.mrb[17].mxu1 }
 0x31d   : > { %v709_v23 = vpop.f32.mrb[18].mxu0  ;;  %v870_v25 = vpop.f32.mrb[18].mxu1 }
 0x31e   : > { %v1428_v27 = vpack.c.bf16 %v709_v23, %v703_v18  ;;  %v1460_v28 = vpack.c.bf16 %v870_v25, %v864_v19  ;;  %v711_v30 = vpop.f32.mrb[19].mxu0  ;;  %v872_v31 = vpop.f32.mrb[19].mxu1 }
 0x31f   : > { %v1426_v32 = vpack.c.bf16 %v711_v30, %v705_v21  ;;  %v1458_v35 = vpack.c.bf16 %v872_v31, %v866_v22  ;;  %v1108_v31 = vld [vmem:[#allocation5] sm:$0xff] }
 0x321   : > { %1427 = vmatprep.subr.bf16.mxu0 %v1426_v32  ;;  %1459 = vmatprep.subr.bf16.mxu1 %v1458_v35  ;;  %v715_v36 = vpop.f32.mrb[20].mxu0  ;;  %v876_v37 = vpop.f32.mrb[20].mxu1  ;;  %v1109_v35 = vld [vmem:[#allocation5 + $0x8] sm:$0xff] }
 0x322   : > { %1429 = vmatpush1.bf16.msra.mxu0 %v1428_v27  ;;  %1461 = vmatpush1.bf16.msra.mxu1 %v1460_v28  ;;  %v717_v38 = vpop.f32.mrb[21].mxu0  ;;  %v878_v39 = vpop.f32.mrb[21].mxu1 }
 0x325   : > { %v721_v40 = vpop.f32.mrb[22].mxu0  ;;  %v882_v41 = vpop.f32.mrb[22].mxu1 }
 0x326   : > { %v1432_v42 = vpack.c.bf16 %v721_v40, %v715_v36  ;;  %v1464_v43 = vpack.c.bf16 %v882_v41, %v876_v37  ;;  %v723_v44 = vpop.f32.mrb[23].mxu0  ;;  %v884_v45 = vpop.f32.mrb[23].mxu1  ;;  %v911_v40 = vld [vmem:[#allocation6] sm:$0xff] }
 0x327   : > { %v1430_v46 = vpack.c.bf16 %v723_v44, %v717_v38  ;;  %v1462_v47 = vpack.c.bf16 %v884_v45, %v878_v39 }
 0x329   : > { %1431 = vmatprep.subr.bf16.mxu0 %v1430_v46  ;;  %1463 = vmatprep.subr.bf16.mxu1 %v1462_v47  ;;  %v727_v48 = vpop.f32.mrb[24].mxu0  ;;  %v888_v49 = vpop.f32.mrb[24].mxu1  ;;  %v915_v47 = vld [vmem:[#allocation6 + $0x20] sm:$0xff] }
 0x32a   : > { %1433 = vmatpush1.bf16.msra.mxu0 %v1432_v42  ;;  %1465 = vmatpush1.bf16.msra.mxu1 %v1464_v43  ;;  %v729_v50 = vpop.f32.mrb[25].mxu0  ;;  %v890_v51 = vpop.f32.mrb[25].mxu1 }
 0x32d   : > { %v733_v52 = vpop.f32.mrb[26].mxu0  ;;  %v894_v53 = vpop.f32.mrb[26].mxu1 }
 0x32e   : > { %v1436_v54 = vpack.c.bf16 %v733_v52, %v727_v48  ;;  %v1468_v55 = vpack.c.bf16 %v894_v53, %v888_v49  ;;  %v735_v56 = vpop.f32.mrb[27].mxu0  ;;  %v896_v57 = vpop.f32.mrb[27].mxu1  ;;  %v917_v48 = vld [vmem:[#allocation6 + $0x30] sm:$0xff]  ;;  %v916_v53 = vld [vmem:[#allocation6 + $0x28] sm:$0xff] }
 0x32f   : > { %v1434_v58 = vpack.c.bf16 %v735_v56, %v729_v50  ;;  %v1466_v59 = vpack.c.bf16 %v896_v57, %v890_v51 }
 0x331   : > { %1435 = vmatprep.subr.bf16.mxu0 %v1434_v58  ;;  %1467 = vmatprep.subr.bf16.mxu1 %v1466_v59  ;;  %v739_v60 = vpop.f32.mrb[28].mxu0  ;;  %v900_v61 = vpop.f32.mrb[28].mxu1 }
 0x332   : > { %1437 = vmatpush1.bf16.msra.mxu0 %v1436_v54  ;;  %1469 = vmatpush1.bf16.msra.mxu1 %v1468_v55  ;;  %v741_v62 = vpop.f32.mrb[29].mxu0  ;;  %v902_v63 = vpop.f32.mrb[29].mxu1  ;;  %v918_v54 = vld [vmem:[#allocation6 + $0x38] sm:$0xff] }
 0x335   : > { %v745_v0 = vpop.f32.mrb[30].mxu0  ;;  %v906_v1 = vpop.f32.mrb[30].mxu1 }
 0x336   : > { %v1440_v2 = vpack.c.bf16 %v745_v0, %v739_v60  ;;  %v1472_v4 = vpack.c.bf16 %v906_v1, %v900_v61  ;;  %v747_v5 = vpop.f32.mrb[31].mxu0  ;;  %v908_v6 = vpop.f32.mrb[31].mxu1 }
 0x337   : > { %v1438_v7 = vpack.c.bf16 %v747_v5, %v741_v62  ;;  %v1470_v8 = vpack.c.bf16 %v908_v6, %v902_v63 }
 0x339   : > { %1439 = vmatprep.subr.bf16.mxu0 %v1438_v7  ;;  %1471 = vmatprep.subr.bf16.mxu1 %v1470_v8  ;;  %v1775_v8 = vmov (!%p1397_p10), 0  }
 0x33a   : > { %1441 = vmatpush1.bf16.msra.mxu0 %v1440_v2  ;;  %1473 = vmatpush1.bf16.msra.mxu1 %v1472_v4 }
 0x33b   : > { %1570 = vset.pattern.permute.xlu0 (!%p1397_p10), %v1775_v8 }
 0x344   : > { %v468_v9 = vpop.permute.xlu1 %467 }
 0x345   : > { %v475_v11 = vsel %vm2056_vm4, %v468_v9, -1e+30 }
 0x348   : > { %v473_v10 = vpop.permute.xlu1 %472 }
 0x349   : > { %v476_v12 = vsel %vm2052_vm3, %v473_v10, -1e+30 }
 0x34a   : > { %v477_v13 = vmax.f32 %v475_v11, %v476_v12 }
 0x34c   : > { %v478_v15 = vrot.slane %v477_v13, 4 }
 0x34e   : > { %v479_v16 = vmax.f32 %v477_v13, %v478_v15 }
 0x350   : > { %v480_v17 = vrot.slane %v479_v16, 2 }
 0x352   : > { %v481_v18 = vmax.f32 %v479_v16, %v480_v17  ;;  %v1134_v16 = vld [vmem:[#allocation10] sm:$0xff] (!%p1397_p10)  ;;  %v1135_v17 = vld [vmem:[#allocation10 + $0x8] sm:$0xff] (!%p1397_p10) }
 0x353   : > { %v922_v39 = vpop.permute.xlu0 %921  ;;  %vm1140_vm8 = vcmp.ge.f32.partialorder (!%p1397_p10), %v1134_v16, 0.0  ;;  %vm1141_vm9 = vcmp.ge.f32.partialorder (!%p1397_p10), %v1135_v17, 0.0 }
 0x354   : > { %v482_v19 = vrot.slane %v481_v18, 1  ;;  %v929_v42 = vmul.f32 %v922_v39, %v911_v40  ;;  %v931_v43 = vmul.f32 %v922_v39, %v913_v20  ;;  %v930_v45 = vmul.f32 %v922_v39, %v912_v24 }
 0x355   : > { %v932_v46 = vmul.f32 %v922_v39, %v914_v26 }
 0x356   : > { %v483_v21 = vmax.f32 %v481_v18, %v482_v19  ;;  %v1146_v18 = vmul.f32 (!%p1397_p10), 0.01, %v1134_v16  ;;  %v1147_v19 = vmul.f32 (!%p1397_p10), 0.01, %v1135_v17 }
 0x358   : > { %v484_v22 = vsub.f32 %v2078_v3, %v483_v21  ;;  %v1137_v21 = vld [vmem:[#allocation10 + $0x18] sm:$0xff] (!%p1397_p10) }
 0x359   : > { %vm1143_vm10 = vcmp.ge.f32.partialorder (!%p1397_p10), %v1137_v21, 0.0 }
 0x35a   : > { %v485_v23 = vmin.f32 %v484_v22, 0.0  ;;  %v1138_v22 = vld [vmem:[#allocation10 + $0x20] sm:$0xff] (!%p1397_p10) }
 0x35b   : > { %vm1144_vm11 = vcmp.ge.f32.partialorder (!%p1397_p10), %v1138_v22, 0.0 }
 0x35c   : > { %v486_v25 = vmul.f32 1.442695, %v485_v23 }
 0x35e   : > { %1566 = vpow2.f32 %v486_v25 }
 0x35f   : > { %1568 = vpow2.f32 %v460_v34  ;;  %v1149_v34 = vmul.f32 (!%p1397_p10), 0.01, %v1137_v21 }
 0x361   : > { %v1155_v39 = vsel (!%p1397_p10), %vm1143_vm10, %v1137_v21, %v1149_v34 }
 0x368   : > { %v1567_v27 = vpop.eup %1566 }
 0x369   : > { %1393 = vmatmul.mubr.msk.f32.vlgmr.msra.gmra.mrb[32].mxu0 %vm2056_vm4, %v1567_v27  ;;  %1395 = vmatmul.mubr.msk.f32.vlgmr.msra.gmra.mrb[32].mxu1 %vm2056_vm4, %v1567_v27  ;;  %v488_v28 = vsel %vm2056_vm4, %v1567_v27, 0.0  ;;  %v489_v3 = vsel %vm2052_vm3, %v1567_v27, 0.0  ;;  %v1569_v30 = vpop.eup %1568 }
 0x36a   : > { %1112 = vadd.xlane.f32.xlu1 %v488_v28  ;;  %1007 = vmatprep.mubr.f32.mxu0 %v1774_v14  ;;  %v1111_v37 = vmul.f32 %v1569_v30, %v1109_v35  ;;  %v1152_v28 = vsel (!%p1397_p10), %vm1140_vm8, %v1134_v16, %v1146_v18 }
 0x36b   : > { %1084 = vmatprep.mubr.f32.mxu1 %v1774_v14  ;;  %v1110_v14 = vmul.f32 %v2149_v29, %v1108_v31 }
 0x36d   : > { %1394 = vmatmul.mubr.msk.f32.gmra.mrb[34].mxu0 %vm2052_vm3, %v1567_v27  ;;  %1396 = vmatmul.mubr.msk.f32.gmra.mrb[34].mxu1 %vm2052_vm3, %v1567_v27 }
 0x36e   : > { %1114 = vadd.xlane.f32.xlu1 %v489_v3  ;;  %v1153_v3 = vsel (!%p1397_p10), %vm1141_vm9, %v1135_v17, %v1147_v19 }
 0x37f   : > { %926 = vperm.xlu1 %1562, %v1569_v30   ;;  %v1150_v30 = vmul.f32 (!%p1397_p10), 0.01, %v1138_v22 }
 0x381   : > { %v1156_v40 = vsel (!%p1397_p10), %vm1144_vm11, %v1138_v22, %v1150_v30 }
 0x383   : > { %1571 = vset.pattern.permute.xlu1 (!%p1397_p10), %v1775_v8 }
 0x3f7   : > { %v1113_v32 = vpop.xlane.xlu1 %1112 }
 0x3f8   : > { %v1116_v36 = vadd.f32 %v1113_v32, %v1110_v14 }
 0x3fa   : > { %1118 = vst.msk [vmem:[#allocation5] sm:$0xff] %vm462_vm6, %v1116_v36 }
 0x3fb   : > { %v1115_v38 = vpop.xlane.xlu1 %1114 }
 0x3fc   : > { %v1117_v33 = vadd.f32 %v1115_v38, %v1111_v37 }
 0x3fe   : > { %1119 = vst.msk [vmem:[#allocation5 + $0x8] sm:$0xff] %vm462_vm6, %v1117_v33 }
 0x3ff   : > { %v927_v41 = vpop.permute.xlu1 %926 }
 0x400   : > { %v933_v57 = vmul.f32 %v927_v41, %v915_v47  ;;  %v935_v58 = vmul.f32 %v927_v41, %v917_v48  ;;  %v934_v61 = vmul.f32 %v927_v41, %v916_v53  ;;  %v936_v62 = vmul.f32 %v927_v41, %v918_v54  ;;  %v1139_v54 = vld [vmem:[#allocation10 + $0x28] sm:$0xff] (!%p1397_p10) }
 0x401   : > { %v1124_v6 = vld [vmem:[#allocation5] sm:$0xff] (!%p1397_p10)  ;;  %vm1145_vm15 = vcmp.ge.f32.partialorder (!%p1397_p10), %v1139_v54, 0.0 }
 0x402   : > { %v1126_v9 = vadd.f32 (!%p1397_p10), 1e-16, %v1124_v6 }
 0x404   : > { %1572 = vrcp.f32 (!%p1397_p10), %v1126_v9 }
 0x405   : > { %v1125_v7 = vld [vmem:[#allocation5 + $0x8] sm:$0xff] (!%p1397_p10) }
 0x406   : > { %v1127_v10 = vadd.f32 (!%p1397_p10), 1e-16, %v1125_v7 }
 0x408   : > { %1574 = vrcp.f32 (!%p1397_p10), %v1127_v10 }
 0x40e   : > { %v1573_v11 = vpop.eup (!%p1397_p10), %1572 }
 0x40f   : > { %1184 = vperm.xlu0 (!%p1397_p10), %1570, %v1573_v11   ;;  %v1132_v12 = vmul.f32 (!%p1397_p10), %v1573_v11, %v1124_v6 }
 0x411   : > { %1160 = vperm.xlu1 (!%p1397_p10), %1571, %v1132_v12  }
 0x412   : > { %v1575_v13 = vpop.eup (!%p1397_p10), %1574 }
 0x413   : > { %v1133_v15 = vmul.f32 (!%p1397_p10), %v1575_v13, %v1125_v7  ;;  %1189 = vperm.xlu0 (!%p1397_p10), %1570, %v1575_v13  }
 0x415   : > { %1165 = vperm.xlu1 (!%p1397_p10), %1571, %v1133_v15  }
 0x43c   : > { %v1003_v44 = vpop.f32.mrb[32].mxu0  ;;  %v1080_v29 = vpop.f32.mrb[32].mxu1 }
 0x43d   : > { %v1091_v49 = vadd.f32 %v1003_v44, %v929_v42  ;;  %v1093_v50 = vadd.f32 %v1080_v29, %v931_v43  ;;  %v1005_v51 = vpop.f32.mrb[33].mxu0  ;;  %v1082_v52 = vpop.f32.mrb[33].mxu1 }
 0x43e   : > { %v1092_v55 = vadd.f32 %v1005_v51, %v930_v45  ;;  %v1094_v56 = vadd.f32 %v1082_v52, %v932_v46  ;;  %1123 = sbr.rel (%p1397_p10) target bundleno = 1299 (0x513), region = 60 }
 0x43f   : > { %1099 = vst [vmem:[#allocation6] sm:$0xff] %v1091_v49  ;;  %1101 = vst [vmem:[#allocation6 + $0x10] sm:$0xff] %v1093_v50  ;;  %v1136_v50 = vld [vmem:[#allocation10 + $0x10] sm:$0xff] (!%p1397_p10) }
 0x440   : > { %1100 = vst [vmem:[#allocation6 + $0x8] sm:$0xff] %v1092_v55  ;;  %1103 = vst.msk [vmem:[#allocation6 + $0x18] sm:$0xff] %vm1102_vm7, %v1094_v56  ;;  %v1009_v59 = vpop.f32.mrb[34].mxu0  ;;  %v1086_v60 = vpop.f32.mrb[34].mxu1  ;;  %v1148_v51 = vmul.f32 (!%p1397_p10), 0.01, %v1136_v50 }
 0x441   : > { %v1095_v63 = vadd.f32 %v1009_v59, %v933_v57  ;;  %v1097_v0 = vadd.f32 %v1086_v60, %v935_v58  ;;  %v1011_v1 = vpop.f32.mrb[35].mxu0  ;;  %v1088_v2 = vpop.f32.mrb[35].mxu1  ;;  %vm1142_vm14 = vcmp.ge.f32.partialorder (!%p1397_p10), %v1136_v50, 0.0  ;;  %v1151_v58 = vmul.f32 (!%p1397_p10), 0.01, %v1139_v54 }
 0x442   : > { %v1096_v4 = vadd.f32 %v1011_v1, %v934_v61  ;;  %v1098_v5 = vadd.f32 %v1088_v2, %v936_v62  ;;  %v1154_v57 = vsel (!%p1397_p10), %vm1142_vm14, %v1136_v50, %v1148_v51 }
 0x443   : > { %1104 = vst [vmem:[#allocation6 + $0x20] sm:$0xff] %v1095_v63  ;;  %1106 = vst [vmem:[#allocation6 + $0x30] sm:$0xff] %v1097_v0  ;;  %v1157_v0 = vsel (!%p1397_p10), %vm1145_vm15, %v1139_v54, %v1151_v58 }
 0x444   : > { %1105 = vst [vmem:[#allocation6 + $0x28] sm:$0xff] %v1096_v4  ;;  %1107 = vst.msk [vmem:[#allocation6 + $0x38] sm:$0xff] %vm1102_vm7, %v1098_v5 }
 0x446   : > { %v1176_v23 = vld [vmem:[#allocation6 + $0x10] sm:$0xff]  ;;  %v1174_v26 = vld [vmem:[#allocation6] sm:$0xff] }
 0x447   : > { %v1177_v25 = vld [vmem:[#allocation6 + $0x18] sm:$0xff]  ;;  %v1175_v41 = vld [vmem:[#allocation6 + $0x8] sm:$0xff] }
 0x44a   : > { %v1180_v32 = vld [vmem:[#allocation6 + $0x30] sm:$0xff]  ;;  %v1178_v46 = vld [vmem:[#allocation6 + $0x20] sm:$0xff] }
 0x44b   : > { %v1181_v35 = vld [vmem:[#allocation6 + $0x38] sm:$0xff]  ;;  %v1179_v47 = vld [vmem:[#allocation6 + $0x28] sm:$0xff] }
 0x48e   : > { %v1185_v27 = vpop.permute.xlu0 %1184 }
 0x48f   : > { %v1194_v31 = vmul.f32 %v1185_v27, %v1176_v23  ;;  %v1195_v14 = vmul.f32 %v1185_v27, %v1177_v25  ;;  %v1192_v29 = vmul.f32 %v1185_v27, %v1174_v26  ;;  %v1193_v45 = vmul.f32 %v1185_v27, %v1175_v41 }
 0x490   : > { %v1161_v36 = vpop.permute.xlu1 %1160 }
 0x491   : > { %1212 = vrot.lane.b32.xlu0 %v1194_v31, %s1776_s21  ;;  %1214 = vrot.lane.b32.xlu1 %v1195_v14, %s1776_s21  ;;  %v1168_v37 = vmul.f32 %v1161_v36, %v1152_v28  ;;  %v1169_v38 = vmul.f32 %v1161_v36, %v1153_v3  ;;  %v1170_v63 = vmul.f32 %v1161_v36, %v1154_v57 }
 0x492   : > { %v1190_v33 = vpop.permute.xlu0 %1189 }
 0x493   : > { %v1198_v20 = vmul.f32 %v1190_v33, %v1180_v32  ;;  %v1199_v24 = vmul.f32 %v1190_v33, %v1181_v35  ;;  %1244 = vst [vmem:[#allocation15] sm:$0xff] %v1168_v37  ;;  %1245 = vst [vmem:[#allocation15 + $0x8] sm:$0xff] %v1169_v38  ;;  %v1196_v48 = vmul.f32 %v1190_v33, %v1178_v46 }
 0x494   : > { %v1166_v42 = vpop.permute.xlu1 %1165  ;;  %v1197_v49 = vmul.f32 %v1190_v33, %v1179_v47 }
 0x495   : > { %1220 = vrot.lane.b32.xlu0 %v1198_v20, %s1776_s21  ;;  %1222 = vrot.lane.b32.xlu1 %v1199_v24, %s1776_s21  ;;  %v1171_v43 = vmul.f32 %v1166_v42, %v1155_v39  ;;  %v1172_v44 = vmul.f32 %v1166_v42, %v1156_v40  ;;  %v1173_v7 = vmul.f32 %v1166_v42, %v1157_v0 }
 0x497   : > { %1250 = vst [vmem:[#allocation15 + $0x30] sm:$0xff] %v1171_v43  ;;  %1251 = vst [vmem:[#allocation15 + $0x38] sm:$0xff] %v1172_v44 }
 0x499   : > { %1208 = vrot.lane.b32.xlu0 %v1192_v29, %s1776_s21  ;;  %1210 = vrot.lane.b32.xlu1 %v1193_v45, %s1776_s21 }
 0x49d   : > { %1216 = vrot.lane.b32.xlu0 %v1196_v48, %s1776_s21  ;;  %1218 = vrot.lane.b32.xlu1 %v1197_v49, %s1776_s21 }
 0x503   : > { %v1213_v52 = vpop.permute.xlu0 %1212  ;;  %v1215_v53 = vpop.permute.xlu1 %1214 }
 0x504   : > { %v1227_v55 = vsel %vm1224_vm12, %v1213_v52, %v1215_v53 }
 0x505   : > { %v1242_v56 = vsel %vm1241_vm13, %v1227_v55, 0.0 }
 0x506   : > { %1249 = vst [vmem:[#allocation15 + $0x28] sm:$0xff] %v1242_v56 }
 0x507   : > { %v1221_v59 = vpop.permute.xlu0 %1220  ;;  %v1223_v60 = vpop.permute.xlu1 %1222 }
 0x508   : > { %v1230_v61 = vsel %vm1224_vm12, %v1221_v59, %v1223_v60 }
 0x509   : > { %v1243_v62 = vsel %vm1241_vm13, %v1230_v61, 0.0 }
 0x50a   : > { %1255 = vst [vmem:[#allocation15 + $0x58] sm:$0xff] %v1243_v62 }
 0x50b   : > { %v1209_v1 = vpop.permute.xlu0 %1208  ;;  %v1211_v2 = vpop.permute.xlu1 %1210 }
 0x50c   : > { %v1239_v4 = vsel %vm1224_vm12, %v1170_v63, %v1209_v1  ;;  %v1225_v5 = vsel %vm1224_vm12, %v1209_v1, %v1211_v2  ;;  %v1226_v6 = vsel %vm1224_vm12, %v1211_v2, %v1213_v52 }
 0x50d   : > { %1246 = vst [vmem:[#allocation15 + $0x10] sm:$0xff] %v1239_v4  ;;  %1247 = vst [vmem:[#allocation15 + $0x18] sm:$0xff] %v1225_v5 }
 0x50e   : > { %1248 = vst [vmem:[#allocation15 + $0x20] sm:$0xff] %v1226_v6 }
 0x50f   : > { %v1217_v8 = vpop.permute.xlu0 %1216  ;;  %v1219_v9 = vpop.permute.xlu1 %1218 }
 0x510   : > { %v1240_v10 = vsel %vm1224_vm12, %v1173_v7, %v1217_v8  ;;  %v1228_v11 = vsel %vm1224_vm12, %v1217_v8, %v1219_v9  ;;  %v1229_v12 = vsel %vm1224_vm12, %v1219_v9, %v1221_v59 }
 0x511   : > { %1252 = vst [vmem:[#allocation15 + $0x40] sm:$0xff] %v1240_v10  ;;  %1253 = vst [vmem:[#allocation15 + $0x48] sm:$0xff] %v1228_v11 }
 0x512   : > { %1254 = vst [vmem:[#allocation15 + $0x50] sm:$0xff] %v1229_v12 }
 0x513 PF: > { %p1513_p12 = scmp.eq.s32.totalorder %s1824_s19, 2  ;;  %s1777_s10 = smov [#allocation15]  }
 0x514   : > { %s1262_s28 = sshll.u32 %s1777_s10, 4  ;;  %s1263_s28 = int_to_ptr.vmem [resolvable:$true] %s1262_s28 }
 0x515   : > { %s1690_s11 = scalar_lea.vmem %s1263_s28, 1536  ;;  %p1697_p9 = scmp.lt.s32.totalorder %s1263_s28, %s1263_s28 }
 0x516   : > { %p1691_p13 = scmp.ne.s32.totalorder %s1263_s28, %s1690_s11  ;;  %p1698_p11 = scmp.lt.s32.totalorder %s1690_s11, %s1690_s11 }
 0x518   : > { %p1692_p0 = pnand %p1691_p13, %p1513_p12  ;;  %p1699_p7 = por %p1698_p11, %p1697_p9 }
 0x51a   : > { %p1693_p3 = pneg %p1692_p0 }
 0x51c   : > { %p1700_p2 = pnand %p1699_p7, %p1693_p3 }
 0x51e   : > { %1703 = shalt.err (!%p1700_p2)
}
 0x51f   : > { %s1704_s13 = scalar_lea.hbm %s2228_s4, 1536 }
 0x520   : > { %p1705_p1 = scmp.ne.s32.totalorder %s2228_s4, %s1704_s13  ;;  %p1710_p5 = scmp.lt.u32.totalorder %s1704_s13, %s2228_s4 }
 0x522   : > { %p1706_p8 = pnand %p1705_p1, %p1513_p12 }
 0x524   : > { %p1707_p4 = pneg %p1706_p8 }
 0x526   : > { %p1712_p6 = pnand %p1710_p5, %p1707_p4 }
 0x528   : > { %1715 = shalt.err (!%p1712_p6)
}
 0x529   : > { %s1778_s26 = smov 768   ;;  %s1779_s27 = smov 48  }
 0x52a   : > { %1489 = dma.vmem_to_hbm [thread:$0]  (%p1513_p12), %s1263_s28, 1536, %s2228_s4, [#allocation9], %s1778_s26, %s1778_s26, %s1779_s27  }
 0x52b   : > { %1745 = dma.done.wait (%p1513_p12), [#allocation9], 1536  }
 0x52c   : > { %1747 = vsyncadd (%p1513_p12), [#allocation9], 4294965760 }
 0x52d PF: > { %p17_p10 = scmp.ge.s32.totalorder %s1927_s8, 5   ;;  %s2254_s15 = smov %s1754_s16 }
 0x52e   : > { %s2255_s16 = smov %s1758_s17  ;;  %s2256_s17 = smov %s1937_s24 }
 0x52f   : > { %s2257_s18 = smov %s1927_s8  ;;  %19 = sbr.rel (!%p17_p10) target bundleno = 6 (0x6), region = 93 }
 0x536   :  { %1278 = vsyncpa [#allocation8], 1 }
 0x537   :  { %1280 = vsyncpa [#allocation8 + $0x1], 1 }
 0x538   :  { %1281 = vsyncpa [#allocation11], 1 }
 0x539   :  { %1282 = vsyncpa [#allocation14], 1 }
 0x53a   :  { %1283 = vsyncpa [#allocation9], 1 }
 0x53b   :  { %1285 = vsyncpa [#allocation9 + $0x1], 1 }

</bundles_post_ra>
